<compile_context>
chip_gen: v7x
topology: tpu7x:2x2x1
jax: 0.10.0
libtpu: 0.0.40
codegen_flags: <defaults>
</compile_context>

<pallas_src>
import jax
import jax.numpy as jnp
from jax.experimental import pallas as pl
from jax.experimental.pallas import tpu as pltpu

NUM_GROUPS = 32
NUM_CHANNELS = 960
CG = NUM_CHANNELS // NUM_GROUPS  # 30 channels per group
EPS = 1e-5


def _round_up(x, m):
    return (x + m - 1) // m * m


def _vmem_budget_and_limit():
    """Generation-aware (data budget for blocks, vmem_limit_bytes)."""
    cap = 64 << 20  # conservative default = v7x per-core VMEM
    try:
        info = pltpu.get_tpu_info()
        cap = int(getattr(info, "vmem_capacity_bytes", cap)) or cap
    except Exception:
        pass
    # Budget for double-buffered blocks + resident params; the limit is passed
    # to the compiler so v5e's 16 MiB default scoped limit does not reject the
    # blocks, while v7x (64 MiB physical) keeps headroom (~48 MiB max).
    budget = min(cap // 2, 32 << 20)
    limit = min(cap * 3 // 4, budget + (16 << 20))
    return budget, limit


def _pick_rows_per_block(total_rows, lanes, itemsize, budget):
    """Rows (groups) per grid step for the flat path, or None -> fallback."""
    cands = [b for b in (8, 16, 32) if total_rows % b == 0]
    resident = 4 * NUM_GROUPS * lanes * 4  # expanded w + b (conservatively 2-buffered)
    fitting = [b for b in cands if 4 * b * lanes * itemsize + resident <= budget]
    if not fitting:
        return None

    def score(b):
        steps = total_rows // b
        blk = b * lanes * itemsize
        s = 0.0
        # Pipeline depth: several steps per TensorCore so DMAs overlap compute.
        s += 3.0 if steps >= 8 else (2.0 if steps >= 4 else (1.0 if steps >= 2 else 0.0))
        # Even grid length -> balanced megacore sharding on v7x.
        s += 0.5 if steps % 2 == 0 else 0.0
        # ~0.25-2 MB blocks already reach the HBM roofline.
        if blk >= (2 << 20):
            s += 1.0
        elif blk >= (512 << 10):
            s += 2.0
        elif blk >= (256 << 10):
            s += 1.5
        elif blk >= (128 << 10):
            s += 1.0
        return (s, blk)

    return max(fitting, key=score)


def _make_flat_kernel(block_rows, wb_rows, n_valid, lanes):
    pad = lanes - n_valid
    inv_count = 1.0 / float(n_valid)

    def kernel(x_ref, w_ref, b_ref, o_ref):
        # x_ref: (block_rows, lanes); one row per (sample, group) slab.
        x = x_ref[...].astype(jnp.float32)

        # Two-pass statistics (biased variance, matches torch.nn.GroupNorm and
        # avoids E[x^2]-mean^2 cancellation).  Reductions hide under the HBM
        # bound on v5e/v6e; single-pass is only worth it on v7x.
        mean = jnp.sum(x, axis=1, keepdims=True) * inv_count
        centered = x - mean
        if pad:
            valid = jax.lax.broadcasted_iota(jnp.int32, (block_rows, lanes), 1) < n_valid
            sq = jnp.where(valid, centered * centered, 0.0)
        else:
            sq = centered * centered
        var = jnp.sum(sq, axis=1, keepdims=True) * inv_count
        inv_std = jax.lax.rsqrt(var + EPS)

        # weight/bias stay resident in VMEM; slice the rows for this block.
        if block_rows < wb_rows:
            start = (pl.program_id(0) % (wb_rows // block_rows)) * block_rows
            start = pl.multiple_of(start, block_rows)
            w = w_ref[pl.ds(start, block_rows), :]
            b = b_ref[pl.ds(start, block_rows), :]
        else:
            w = w_ref[...]
            b = b_ref[...]

        # Reuse `centered` so x does not stay live past the variance pass.
        o_ref[...] = (centered * (inv_std * w) + b).astype(o_ref.dtype)

    return kernel


def _group_norm_spatial_tiled(x, weight, bias, vmem_limit):
    """Two-pass fallback for large H*W: tile the spatial (lane) axis."""
    N, C, H, W = x.shape
    HW = H * W
    G = NUM_GROUPS
    R = N * G
    itemsize = jnp.dtype(x.dtype).itemsize

    BR = 8  # rows (sample, group slabs) per block; divides R = 32*N and G
    # Lane chunk over the HW axis: multiple of 128, targeting ~1 MB x-blocks.
    T = (1 << 20) // (BR * CG * itemsize)
    T = max(128, (T // 128) * 128)
    T = min(T, _round_up(HW, 128))
    HWp = _round_up(HW, T)
    n_chunks = HWp // T

    x3 = x.reshape(R, CG, HW)
    if HWp != HW:
        x3 = jnp.pad(x3, ((0, 0), (0, 0), (0, HWp - HW)))
    w3 = weight.astype(jnp.float32).reshape(G, CG, 1)
    b3 = bias.astype(jnp.float32).reshape(G, CG, 1)

    inv_count = 1.0 / float(CG * HW)

    # ---- pass 1: per-(sample, group) mean / inv_std --------------------------
    # Single traversal with sum / sum-of-squares (padded zeros contribute 0).
    # TODO(synk): switch to a chunked two-pass scheme if input magnitudes ever
    # make the E[x^2]-mean^2 cancellation a concern on this path.
    def stats_kernel(x_ref, mean_ref, rstd_ref):
        j = pl.program_id(1)

        @pl.when(j == 0)
        def _():
            mean_ref[...] = jnp.zeros_like(mean_ref)
            rstd_ref[...] = jnp.zeros_like(rstd_ref)

        xb = x_ref[...].astype(jnp.float32)  # (BR, CG, T)
        mean_ref[...] += jnp.sum(xb, axis=(1, 2), keepdims=True)
        rstd_ref[...] += jnp.sum(xb * xb, axis=(1, 2), keepdims=True)

        @pl.when(j == pl.num_programs(1) - 1)
        def _():
            mean = mean_ref[...] * inv_count
            var = rstd_ref[...] * inv_count - mean * mean
            mean_ref[...] = mean
            rstd_ref[...] = jax.lax.rsqrt(jnp.maximum(var, 0.0) + EPS)

    mean_arr, rstd_arr = pl.pallas_call(
        stats_kernel,
        out_shape=(jax.ShapeDtypeStruct((R, 1, 1), jnp.float32),
                   jax.ShapeDtypeStruct((R, 1, 1), jnp.float32)),
        grid_spec=pltpu.PrefetchScalarGridSpec(
            num_scalar_prefetch=0,
            grid=(R // BR, n_chunks),
            in_specs=[pl.BlockSpec((BR, CG, T), lambda i, j: (i, 0, j))],
            out_specs=[pl.BlockSpec((BR, 1, 1), lambda i, j: (i, 0, 0)),
                       pl.BlockSpec((BR, 1, 1), lambda i, j: (i, 0, 0))],
        ),
        compiler_params=pltpu.CompilerParams(
            dimension_semantics=("parallel", "arbitrary"),
            vmem_limit_bytes=vmem_limit,
        ),
    )(x3)

    # ---- pass 2: normalize + folded per-channel affine -----------------------
    def apply_kernel(x_ref, mean_ref, rstd_ref, w_ref, b_ref, o_ref):
        xb = x_ref[...].astype(jnp.float32)  # (BR, CG, T)
        mean = mean_ref[...]                  # (BR, 1, 1)
        rstd = rstd_ref[...]                  # (BR, 1, 1)
        start = (pl.program_id(0) % (G // BR)) * BR
        start = pl.multiple_of(start, BR)
        w = w_ref[pl.ds(start, BR), :, :]     # (BR, CG, 1), params stay resident
        b = b_ref[pl.ds(start, BR), :, :]
        scale = rstd * w
        shift = b - mean * scale
        o_ref[...] = (xb * scale + shift).astype(o_ref.dtype)

    out = pl.pallas_call(
        apply_kernel,
        out_shape=jax.ShapeDtypeStruct((R, CG, HWp), x.dtype),
        grid_spec=pltpu.PrefetchScalarGridSpec(
            num_scalar_prefetch=0,
            grid=(R // BR, n_chunks),
            in_specs=[
                pl.BlockSpec((BR, CG, T), lambda i, j: (i, 0, j)),
                pl.BlockSpec((BR, 1, 1), lambda i, j: (i, 0, 0)),
                pl.BlockSpec((BR, 1, 1), lambda i, j: (i, 0, 0)),
                pl.BlockSpec((G, CG, 1), lambda i, j: (0, 0, 0)),
                pl.BlockSpec((G, CG, 1), lambda i, j: (0, 0, 0)),
            ],
            out_specs=pl.BlockSpec((BR, CG, T), lambda i, j: (i, 0, j)),
        ),
        compiler_params=pltpu.CompilerParams(
            dimension_semantics=("parallel", "parallel"),
            vmem_limit_bytes=vmem_limit,
        ),
    )(x3, mean_arr, rstd_arr, w3, b3)

    if HWp != HW:
        out = out[:, :, :HW]
    return out.reshape(N, C, H, W)


def group_norm(x, weight, bias, *, force_spatial_tiling=False):
    """GroupNorm(32, 960) forward with affine params. x is NCHW."""
    N, C, H, W = x.shape
    assert C == NUM_CHANNELS
    HW = H * W
    G = NUM_GROUPS
    R = N * G
    L = CG * HW
    Lp = _round_up(L, 128)
    itemsize = jnp.dtype(x.dtype).itemsize

    budget, vmem_limit = _vmem_budget_and_limit()
    B = None if force_spatial_tiling else _pick_rows_per_block(R, Lp, itemsize, budget)
    if B is None:
        return _group_norm_spatial_tiled(x, weight, bias, vmem_limit)

    # Flatten each (sample, group) slab to a single lane-dense axis and pad to
    # a multiple of 128; expand weight/bias to the same layout once (resident).
    x_flat = x.reshape(R, L)
    w_flat = jnp.broadcast_to(
        weight.astype(jnp.float32).reshape(G, CG, 1), (G, CG, HW)).reshape(G, L)
    b_flat = jnp.broadcast_to(
        bias.astype(jnp.float32).reshape(G, CG, 1), (G, CG, HW)).reshape(G, L)
    if Lp != L:
        x_flat = jnp.pad(x_flat, ((0, 0), (0, Lp - L)))
        w_flat = jnp.pad(w_flat, ((0, 0), (0, Lp - L)))
        b_flat = jnp.pad(b_flat, ((0, 0), (0, Lp - L)))

    num_blocks = R // B
    kernel = _make_flat_kernel(B, G, L, Lp)

    out = pl.pallas_call(
        kernel,
        out_shape=jax.ShapeDtypeStruct((R, Lp), x.dtype),
        grid_spec=pltpu.PrefetchScalarGridSpec(
            num_scalar_prefetch=0,
            grid=(num_blocks,),
            in_specs=[
                pl.BlockSpec((B, Lp), lambda i: (i, 0)),
                # Constant index map -> the param tables are DMA'd once and
                # stay resident in VMEM across the whole grid.
                pl.BlockSpec((G, Lp), lambda i: (0, 0)),
                pl.BlockSpec((G, Lp), lambda i: (0, 0)),
            ],
            out_specs=pl.BlockSpec((B, Lp), lambda i: (i, 0)),
        ),
        compiler_params=pltpu.CompilerParams(
            dimension_semantics=("parallel",),
            vmem_limit_bytes=vmem_limit,
        ),
    )(x_flat, w_flat, b_flat)

    if Lp != L:
        out = out[:, :L]
    return out.reshape(N, C, H, W)


def _reference_group_norm(x, weight, bias):
    N, C, H, W = x.shape
    xg = x.reshape(N, NUM_GROUPS, CG * H * W)
    mean = jnp.mean(xg, axis=-1, keepdims=True)
    var = jnp.mean((xg - mean) ** 2, axis=-1, keepdims=True)
    y = (xg - mean) * jax.lax.rsqrt(var + EPS)
    y = y.reshape(N, C, H, W)
    return y * weight.reshape(1, C, 1, 1) + bias.reshape(1, C, 1, 1)


if __name__ == "__main__":
    key = jax.random.PRNGKey(0)
    kx, kw, kb = jax.random.split(key, 3)

    # Small shapes consistent with GroupNorm(32, 960): C must be 960.
    N, C, H, W = 2, NUM_CHANNELS, 16, 16
    x = jax.random.normal(kx, (N, C, H, W), dtype=jnp.float32)
    weight = jax.random.normal(kw, (C,), dtype=jnp.float32)
    bias = jax.random.normal(kb, (C,), dtype=jnp.float32)

    y = group_norm(x, weight, bias)
    jax.block_until_ready(y)
    y_ref = _reference_group_norm(x, weight, bias)
    assert jnp.allclose(y, y_ref, atol=1e-4, rtol=1e-4), "main path mismatch"

    # Non-128-aligned H*W (exercises the zero-padded, masked-variance path).
    x14 = jax.random.normal(kx, (N, C, 14, 14), dtype=jnp.float32)
    y14 = group_norm(x14, weight, bias)
    jax.block_until_ready(y14)
    assert jnp.allclose(y14, _reference_group_norm(x14, weight, bias),
                        atol=1e-4, rtol=1e-4), "padded path mismatch"

    # Spatially tiled two-pass fallback (large-H*W path), forced on a small
    # shape that still produces multiple lane chunks.
    x_big = jax.random.normal(kx, (1, C, 40, 40), dtype=jnp.float32)
    y_fb = group_norm(x_big, weight, bias, force_spatial_tiling=True)
    jax.block_until_ready(y_fb)
    assert jnp.allclose(y_fb, _reference_group_norm(x_big, weight, bias),
                        atol=1e-3, rtol=1e-3), "fallback path mismatch"

    print("KERNEL_OK")
</pallas_src>

<mosaic_0001>
module attributes {stable_mosaic.version = 11 : i64} {
  func.func @kernel(%arg0: i32, %arg1: memref<8x7680xf32, #tpu.memory_space<vmem>>, %arg2: memref<32x7680xf32, #tpu.memory_space<vmem>>, %arg3: memref<32x7680xf32, #tpu.memory_space<vmem>>, %arg4: memref<8x7680xf32, #tpu.memory_space<vmem>>) attributes {dimension_semantics = [#tpu.dimension_semantics<parallel>], iteration_bounds = array<i64: 8>, scalar_prefetch = 0 : i64, scratch_operands = 0 : i64, tpu.core_type = #tpu.core_type<tc>, window_params = [{transform_indices = @transform_0, window_bounds = array<i64: 8, 7680>}, {pipeline_mode = #tpu.pipeline_mode<synchronous>, transform_indices = @transform_1, window_bounds = array<i64: 32, 7680>}, {pipeline_mode = #tpu.pipeline_mode<synchronous>, transform_indices = @transform_2, window_bounds = array<i64: 32, 7680>}, {transform_indices = @transform_3, window_bounds = array<i64: 8, 7680>}]} {
    %c0 = arith.constant 0 : index
    %c0_0 = arith.constant 0 : index
    %0 = vector.load %arg1[%c0, %c0_0] : memref<8x7680xf32, #tpu.memory_space<vmem>>, vector<8x7680xf32>
    %cst = arith.constant dense<0.000000e+00> : vector<8xf32>
    %1 = vector.multi_reduction <add>, %0, %cst [1] : vector<8x7680xf32> to vector<8xf32>
    %2 = vector.shape_cast %1 : vector<8xf32> to vector<8x1xf32>
    %cst_1 = arith.constant 1.3020834E-4 : f32
    %3 = vector.broadcast %cst_1 : f32 to vector<8x1xf32>
    %4 = arith.mulf %2, %3 : vector<8x1xf32>
    %5 = vector.broadcast %4 : vector<8x1xf32> to vector<8x7680xf32>
    %6 = arith.subf %0, %5 : vector<8x7680xf32>
    %7 = arith.mulf %6, %6 : vector<8x7680xf32>
    %cst_2 = arith.constant dense<0.000000e+00> : vector<8xf32>
    %8 = vector.multi_reduction <add>, %7, %cst_2 [1] : vector<8x7680xf32> to vector<8xf32>
    %9 = vector.shape_cast %8 : vector<8xf32> to vector<8x1xf32>
    %cst_3 = arith.constant 1.3020834E-4 : f32
    %10 = vector.broadcast %cst_3 : f32 to vector<8x1xf32>
    %11 = arith.mulf %9, %10 : vector<8x1xf32>
    %cst_4 = arith.constant 9.99999974E-6 : f32
    %12 = vector.broadcast %cst_4 : f32 to vector<8x1xf32>
    %13 = arith.addf %11, %12 : vector<8x1xf32>
    %14 = math.rsqrt %13 : vector<8x1xf32>
    %c4_i32 = arith.constant 4 : i32
    %c0_i32 = arith.constant 0 : i32
    %15 = arith.cmpi eq, %c4_i32, %c0_i32 : i32
    %c1_i32 = arith.constant 1 : i32
    %16 = arith.select %15, %c1_i32, %c4_i32 : i32
    %17 = arith.remsi %arg0, %16 : i32
    %c0_i32_5 = arith.constant 0 : i32
    %18 = arith.cmpi ne, %17, %c0_i32_5 : i32
    %c0_i32_6 = arith.constant 0 : i32
    %19 = arith.cmpi slt, %17, %c0_i32_6 : i32
    %c0_i32_7 = arith.constant 0 : i32
    %20 = arith.cmpi slt, %16, %c0_i32_7 : i32
    %21 = arith.xori %19, %20 : i1
    %22 = arith.andi %21, %18 : i1
    %23 = arith.addi %17, %16 : i32
    %24 = arith.select %22, %23, %17 : i32
    %c8_i32 = arith.constant 8 : i32
    %25 = arith.muli %24, %c8_i32 : i32
    %26 = tpu.assume_multiple %25, 8 : i32
    %27 = arith.index_cast %26 : i32 to index
    %c0_8 = arith.constant 0 : index
    %28 = vector.load %arg2[%27, %c0_8] : memref<32x7680xf32, #tpu.memory_space<vmem>>, vector<8x7680xf32>
    %29 = arith.index_cast %26 : i32 to index
    %c0_9 = arith.constant 0 : index
    %30 = vector.load %arg3[%29, %c0_9] : memref<32x7680xf32, #tpu.memory_space<vmem>>, vector<8x7680xf32>
    %31 = vector.broadcast %14 : vector<8x1xf32> to vector<8x7680xf32>
    %32 = arith.mulf %31, %28 : vector<8x7680xf32>
    %33 = arith.mulf %6, %32 : vector<8x7680xf32>
    %34 = arith.addf %33, %30 : vector<8x7680xf32>
    %c0_10 = arith.constant 0 : index
    %c0_11 = arith.constant 0 : index
    %35 = vector.load %arg4[%c0_10, %c0_11] : memref<8x7680xf32, #tpu.memory_space<vmem>>, vector<8x7680xf32>
    tpu.vector_store %arg4[%c0_10, %c0_11], %34 {strides = array<i32>} : memref<8x7680xf32, #tpu.memory_space<vmem>>, vector<8x7680xf32>,
    return
  }
  func.func @transform_0(%arg0: i32) -> (i32, i32) {
    %c0_i32 = arith.constant 0 : i32
    %c0_i32_0 = arith.constant 0 : i32
    return %arg0, %c0_i32 : i32, i32
  }
  func.func @transform_1(%arg0: i32) -> (i32, i32) {
    %c0_i32 = arith.constant 0 : i32
    %c0_i32_0 = arith.constant 0 : i32
    %c0_i32_1 = arith.constant 0 : i32
    return %c0_i32, %c0_i32_0 : i32, i32
  }
  func.func @transform_2(%arg0: i32) -> (i32, i32) {
    %c0_i32 = arith.constant 0 : i32
    %c0_i32_0 = arith.constant 0 : i32
    %c0_i32_1 = arith.constant 0 : i32
    return %c0_i32, %c0_i32_0 : i32, i32
  }
  func.func @transform_3(%arg0: i32) -> (i32, i32) {
    %c0_i32 = arith.constant 0 : i32
    %c0_i32_0 = arith.constant 0 : i32
    return %arg0, %c0_i32 : i32, i32
  }
}

</mosaic_0001>

<bundles_post_ra>
// kernel: tpu_custom_call.1
= control target key start
LH: loop header
LB: loop body
LE: loop exit
PB: predicated region body
PF: predicated region fallthrough
CT: control target
= control target key end

     0   :  { %8 = vsyncpa [#allocation3], 0  ;;  %s2798_s0 = inlined_call_operand.hbm [shape: f32[64,7680], index: 0, kind: input, shape index: {}]   ;;  %s2799_s1 = inlined_call_operand.hbm [shape: f32[32,7680], index: 1, kind: input, shape index: {}]   ;;  %s2800_s2 = inlined_call_operand.hbm [shape: f32[32,7680], index: 2, kind: input, shape index: {}]   ;;  %s2801_s3 = inlined_call_operand.hbm [shape: f32[64,7680], index: 3, kind: output, shape index: {}]  }
   0x1   :  { %10 = vsyncpa [#allocation3 + $0x1], 0 }
   0x2   :  { %11 = vsyncpa [#allocation6], 0 }
   0x3   :  { %12 = vsyncpa [#allocation4], 0 }
   0x4   :  { %14 = vsyncpa [#allocation4 + $0x1], 0  ;;  %s1289_s12 = smov 0   ;;  %s1291_s13 = smov 0  }
   0x5   :  { %s1293_s14 = smov 0   ;;  %s1295_s15 = smov 0  }
   0x6 LB: > { %s1310_s16 = sadd.s32 4294967295, %s1261_s15   ;;  %s1010_s17 = sadd.s32 4294967294, %s1261_s15   ;;  %s1261_s15 = sphi %s1295_s15, %s3074_s15   ;;  %s1257_s14 = sphi %s1293_s14, %s3073_s14   ;;  %s1253_s13 = sphi %s1291_s13, %s3072_s13   ;;  %s1249_s12 = sphi %s1289_s12, %s3071_s12  }
   0x7   : > { %p40_p0 = scmp.ne.s32.totalorder %s1253_s13, %s1249_s12  ;;  %p2802_p1 = scmp.eq.s32.totalorder %s1310_s16, 0 }
   0x8   : > { %p112_p3 = scmp.eq.s32.totalorder %s1010_s17, 7  ;;  %p1011_p5 = scmp.ge.s32.totalorder %s1261_s15, 1 }
   0x9   : > { %p1319_p4 = por %p2802_p1, %p40_p0  ;;  %p119_p7 = scmp.lt.s32.totalorder %s1261_s15, 9 }
   0xa   : > { %p1324_p6 = por %p112_p3, %p40_p0  ;;  %s1263_s21 = smov [#allocation5]  }
   0xb   : > { %s2855_s18 = scalar_select %p1319_p4, 1, 0 }
   0xc   : > { %s2856_s19 = scalar_select %p1324_p6, 1, 0 }
   0xd   : > { %p1329_p8 = pnand %p1011_p5, %p119_p7  ;;  %s131_s22 = sshll.u32 %s1263_s21, 4  ;;  %s132_s22 = int_to_ptr.vmem [resolvable:$true] %s131_s22 }
   0xe   : > { %s1264_s24 = smov [#allocation7]   ;;  %s1105_s28 = scalar_lea.hbm %s2799_s1, 30720 }
   0xf   : > { %s2857_s20 = scalar_select %p1329_p8, 1, 0 }
  0x10   : > { %p1046_p9 = pneg %p1329_p8  ;;  %s144_s25 = sshll.u32 %s1264_s24, 4  ;;  %s1341_s25 = int_to_ptr.vmem [resolvable:$true] %s144_s25 }
  0x11   : > { %p1106_p11 = scmp.ne.s32.totalorder %s2799_s1, %s1105_s28  ;;  %p1112_p3 = scmp.lt.u32.totalorder %s1105_s28, %s2799_s1 }
  0x12   : > { %p1337_p10 = pnand %p1046_p9, %p2802_p1 }
  0x14   : > { %p1107_p12 = pneg %p1337_p10 }
  0x16   : > { %p1108_p13 = pnand %p1107_p12, %p1106_p11 }
  0x18   : > { %p1109_p0 = pneg %p1108_p13 }
  0x1a   : > { %p1114_p5 = pnand %p1112_p3, %p1109_p0 }
  0x1c   : > { %1117 = shalt.err (!%p1114_p5)
}
  0x1d   : > { %s1118_s6 = scalar_lea.vmem %s132_s22, 30720  ;;  %p1126_p2 = scmp.lt.s32.totalorder %s132_s22, %s132_s22 }
  0x1e   : > { %p1119_p7 = scmp.ne.s32.totalorder %s132_s22, %s1118_s6  ;;  %p1127_p6 = scmp.lt.s32.totalorder %s1118_s6, %s1118_s6 }
  0x20   : > { %p1121_p9 = pnand %p1119_p7, %p1107_p12  ;;  %p1128_p4 = por %p1127_p6, %p1126_p2 }
  0x22   : > { %p1122_p1 = pneg %p1121_p9 }
  0x24   : > { %p1129_p8 = pnand %p1128_p4, %p1122_p1 }
  0x26   : > { %1132 = shalt.err (!%p1129_p8)
}
  0x27   : > { %s1265_s7 = smov 7680   ;;  %s1266_s8 = smov 480  }
  0x28   : > { %1049 = dma.hbm_to_vmem [thread:$0]  (!%p1337_p10), %s2799_s1, 30720, %s132_s22, [#allocation6], %s1265_s7, %s1265_s7, %s1266_s8  }
  0x29   : > { %s1133_s21 = scalar_lea.hbm %s2800_s2, 30720 }
  0x2a   : > { %p1134_p11 = scmp.ne.s32.totalorder %s2800_s2, %s1133_s21  ;;  %p1140_p4 = scmp.lt.u32.totalorder %s1133_s21, %s2800_s2 }
  0x2c   : > { %p1136_p1 = pnand %p1134_p11, %p1107_p12 }
  0x2e   : > { %p1137_p2 = pneg %p1136_p1 }
  0x30   : > { %p1142_p6 = pnand %p1140_p4, %p1137_p2 }
  0x32   : > { %1145 = shalt.err (!%p1142_p6)
}
  0x33   : > { %s1146_s22 = scalar_lea.vmem %s1341_s25, 30720  ;;  %p1154_p3 = scmp.lt.s32.totalorder %s1341_s25, %s1341_s25 }
  0x34   : > { %p1147_p8 = scmp.ne.s32.totalorder %s1341_s25, %s1146_s22  ;;  %p1155_p5 = scmp.lt.s32.totalorder %s1146_s22, %s1146_s22 }
  0x36   : > { %p1149_p13 = pnand %p1147_p8, %p1107_p12  ;;  %p1156_p7 = por %p1155_p5, %p1154_p3 }
  0x38   : > { %p1150_p0 = pneg %p1149_p13 }
  0x3a   : > { %p1157_p9 = pnand %p1156_p7, %p1150_p0 }
  0x3c   : > { %1160 = shalt.err (!%p1157_p9)
}
  0x3d   : > { %1052 = dma.hbm_to_vmem [thread:$0]  (!%p1337_p10), %s2800_s2, 30720, %s1341_s25, [#allocation6], %s1265_s7, %s1265_s7, %s1266_s8  }
  0x3e   : > { %s1391_s4 = sadd.s32 1, %s1261_s15   ;;  %s27_s23 = sadd.s32 1, %s1257_s14 }
  0x3f   : > { %s24_s5 = ssub.s32 %s1261_s15, %s1391_s4  ;;  %p34_p12 = scmp.ne.s32.totalorder %s1257_s14, %s1253_s13 }
  0x40   : > { %p25_p11 = scmp.eq.s32.totalorder %s24_s5, 0  ;;  %p35_p1 = scmp.eq.s32.totalorder %s1261_s15, 0 }
  0x41   : > { %p2859_p2 = scmp.eq.s32.totalorder %s1310_s16, 7  ;;  %p1063_p6 = scmp.lt.s32.totalorder %s1261_s15, 8 }
  0x42   : > { %s1407_s9 = scalar_select %p25_p11, %s1257_s14, %s27_s23  }
  0x43   : > { %p1401_p4 = por %p2859_p2, %p34_p12  ;;  %p36_p8 = por %p35_p1, %p34_p12 }
  0x44   : > { %s158_s10 = sand.u32 1, %s1257_s14   ;;  %s1031_s25 = smul.u32 7680, %s1261_s15 }
  0x45   : > { %s1030_s11 = smul.u32 480, %s158_s10  ;;  %p1411_p10 = pnand %p1063_p6, %p36_p8 }
  0x46   : > { %s1418_s21 = scalar_lea.hbm %s2798_s0, %s1031_s25  ;;  %s159_s27 = scalar_lea.sflag [#allocation3], %s158_s10 }
  0x47   : > { %s162_s24 = scalar_lea.vmem [#allocation2], %s1030_s11  ;;  %s1161_s28 = scalar_lea.hbm %s1418_s21, 7680 }
  0x48   : > { %s170_s26 = sshll.u32 %s162_s24, 4  ;;  %p1162_p13 = scmp.ne.s32.totalorder %s1418_s21, %s1161_s28  ;;  %s1420_s26 = int_to_ptr.vmem [resolvable:$true] %s170_s26 }
  0x49   : > { %p1163_p0 = pneg %p1411_p10  ;;  %s1166_s30 = scalar_lea.hbm %s2798_s0, 61440 }
  0x4a   : > { %p1167_p7 = scmp.lt.u32.totalorder %s1418_s21, %s2798_s0  ;;  %p1168_p9 = scmp.lt.u32.totalorder %s1166_s30, %s1161_s28 }
  0x4b   : > { %p1164_p3 = pnand %p1163_p0, %p1162_p13  ;;  %p1170_p11 = scmp.lt.u32.totalorder %s1161_s28, %s1418_s21 }
  0x4c   : > { %p1169_p12 = por %p1168_p9, %p1167_p7 }
  0x4d   : > { %p1165_p5 = pneg %p1164_p3 }
  0x4e   : > { %p1171_p1 = por %p1170_p11, %p1169_p12 }
  0x50   : > { %p1172_p2 = pnand %p1171_p1, %p1165_p5 }
  0x52   : > { %1175 = shalt.err (!%p1172_p2)
}
  0x53   : > { %s1176_s10 = scalar_lea.vmem %s1420_s26, 7680  ;;  %s1267_s11 = smov [#allocation2]  }
  0x54   : > { %p1177_p6 = scmp.ne.s32.totalorder %s1420_s26, %s1176_s10  ;;  %s1181_s25 = sshll.u32 %s1267_s11, 4  ;;  %s1182_s25 = int_to_ptr.vmem [resolvable:$false] %s1181_s25 }
  0x55   : > { %s1183_s8 = scalar_lea.vmem %s1182_s25, 15360  ;;  %p1184_p3 = scmp.lt.s32.totalorder %s1420_s26, %s1182_s25 }
  0x56   : > { %p1179_p8 = pnand %p1177_p6, %p1163_p0  ;;  %p1185_p7 = scmp.lt.s32.totalorder %s1183_s8, %s1176_s10 }
  0x58   : > { %p1180_p13 = pneg %p1179_p8  ;;  %p1186_p9 = por %p1185_p7, %p1184_p3 }
  0x5a   : > { %p1187_p12 = pnand %p1186_p9, %p1180_p13 }
  0x5c   : > { %1190 = shalt.err (!%p1187_p12)
}
  0x5d   : > { %1056 = dma.hbm_to_vmem [thread:$0]  (!%p1411_p10), %s1418_s21, 7680, %s1420_s26, %s159_s27  }
  0x5e   : > { %p2862_p5 = scmp.ne.s32.totalorder %s2857_s20, 0 }
  0x60   : > { %179 = sbr.rel (%p2862_p5) target bundleno = 751 (0x2ef), region = 32 }
  0x67   : > { %s1450_s17 = sand.u32 1, %s1253_s13   ;;  %p2863_p0 = scmp.ne.s32.totalorder %s2855_s18, 0 }
  0x68   : > { %s1032_s24 = smul.u32 480, %s1450_s17  ;;  %s182_s28 = scalar_lea.sflag [#allocation3], %s1450_s17 }
  0x6a   : > { %s1456_s22 = scalar_lea.vmem [#allocation2], %s1032_s24 }
  0x6b   : > { %1236 = dma.done.wait (%p2863_p0), %s182_s28, 7680  }
  0x6c   : > { %1238 = vsyncadd (%p2863_p0), %s182_s28, 4294959616  ;;  %p2864_p10 = scmp.eq.s32.totalorder %s1310_s16, 0 }
  0x6e   : > { %1240 = dma.done.wait (%p2864_p10), [#allocation6], 61440   ;;  %p2865_p11 = pmov %p2864_p10 }
  0x6f   : > { %v1467_v0 = vld [vmem:[%s1456_s22] sm:$0xff]  ;;  %v1470_v1 = vld [vmem:[%s1456_s22 + $0x8] sm:$0xff]  ;;  %v1473_v2 = vld [vmem:[%s1456_s22 + $0x10] sm:$0xff]  ;;  %s523_s18 = ssub.s32 0, %s1310_s16  ;;  %p522_p1 = scmp.lt.s32.totalorder %s1310_s16, 0 }
  0x70   : > { %1242 = vsyncadd (%p2865_p11), [#allocation6], 4294905856  ;;  %v276_v3 = vadd.f32 %v1470_v1, %v1467_v0  ;;  %v1478_v4 = vld [vmem:[%s1456_s22 + $0x18] sm:$0xff]  ;;  %v1482_v6 = vld [vmem:[%s1456_s22 + $0x20] sm:$0xff]  ;;  %s1019_s20 = smin.u32 %s1310_s16, %s523_s18  ;;  %s2610_s10 = scalar_lea.vmem [#allocation8], %s1032_s24 }
  0x71   : > { %v1486_v8 = vld [vmem:[%s1456_s22 + $0x28] sm:$0xff]  ;;  %v1490_v10 = vld [vmem:[%s1456_s22 + $0x30] sm:$0xff]  ;;  %v1494_v12 = vld [vmem:[%s1456_s22 + $0x38] sm:$0xff]  ;;  %s525_s7 = sand.u32 3, %s1019_s20   ;;  %s1033_s11 = smul.u32 7680, %s1310_s16 }
  0x72   : > { %v277_v5 = vadd.f32 %v276_v3, %v1473_v2  ;;  %v1498_v14 = vld [vmem:[%s1456_s22 + $0x40] sm:$0xff]  ;;  %v1502_v16 = vld [vmem:[%s1456_s22 + $0x48] sm:$0xff]  ;;  %v1506_v18 = vld [vmem:[%s1456_s22 + $0x50] sm:$0xff]  ;;  %s526_s21 = ssub.s32 0, %s525_s7  ;;  %s917_s25 = sshll.u32 %s2610_s10, 4  ;;  %s2749_s25 = int_to_ptr.vmem [resolvable:$true] %s917_s25 }
  0x73   : > { %v1510_v20 = vld [vmem:[%s1456_s22 + $0x58] sm:$0xff]  ;;  %v1514_v22 = vld [vmem:[%s1456_s22 + $0x60] sm:$0xff]  ;;  %v1518_v24 = vld [vmem:[%s1456_s22 + $0x68] sm:$0xff]  ;;  %s3076_s21 = smov (!%p522_p1, %s526_s21), %s525_s7  ;;  %s2747_s28 = scalar_lea.hbm %s2801_s3, %s1033_s11 }
  0x74   : > { %v278_v7 = vadd.f32 %v277_v5, %v1478_v4  ;;  %v1522_v26 = vld [vmem:[%s1456_s22 + $0x70] sm:$0xff]  ;;  %v1526_v28 = vld [vmem:[%s1456_s22 + $0x78] sm:$0xff]  ;;  %v1530_v30 = vld [vmem:[%s1456_s22 + $0x80] sm:$0xff]  ;;  %p1021_p2 = scmp.lt.s32.totalorder %s3076_s21, 0  ;;  %s532_s26 = sadd.s32 4, %s3076_s21 }
  0x75   : > { %v1534_v32 = vld [vmem:[%s1456_s22 + $0x88] sm:$0xff]  ;;  %v1538_v34 = vld [vmem:[%s1456_s22 + $0x90] sm:$0xff]  ;;  %v1542_v36 = vld [vmem:[%s1456_s22 + $0x98] sm:$0xff]  ;;  %s1191_s16 = scalar_lea.vmem %s2749_s25, 7680  ;;  %s1268_s18 = smov [#allocation8]  }
  0x76   : > { %v279_v9 = vadd.f32 %v278_v7, %v1482_v6  ;;  %v1546_v38 = vld [vmem:[%s1456_s22 + $0xa0] sm:$0xff]  ;;  %v1550_v40 = vld [vmem:[%s1456_s22 + $0xa8] sm:$0xff]  ;;  %v1554_v42 = vld [vmem:[%s1456_s22 + $0xb0] sm:$0xff]  ;;  %s3078_s26 = smov (!%p1021_p2, %s532_s26), %s3076_s21  ;;  %p1192_p6 = scmp.ne.s32.totalorder %s2749_s25, %s1191_s16 }
  0x77   : > { %v1558_v44 = vld [vmem:[%s1456_s22 + $0xb8] sm:$0xff]  ;;  %v1562_v46 = vld [vmem:[%s1456_s22 + $0xc0] sm:$0xff]  ;;  %v1566_v48 = vld [vmem:[%s1456_s22 + $0xc8] sm:$0xff]  ;;  %s1022_s27 = sshll.u32 %s3078_s26, 3  ;;  %s1195_s20 = sshll.u32 %s1268_s18, 4  ;;  %s1196_s20 = int_to_ptr.vmem [resolvable:$false] %s1195_s20 }
  0x78   : > { %v280_v11 = vadd.f32 %v279_v9, %v1486_v8  ;;  %v1570_v50 = vld [vmem:[%s1456_s22 + $0xd0] sm:$0xff]  ;;  %v1574_v52 = vld [vmem:[%s1456_s22 + $0xd8] sm:$0xff]  ;;  %v1578_v54 = vld [vmem:[%s1456_s22 + $0xe0] sm:$0xff]  ;;  %s2071_s29 = sshra.s32 %s1022_s27, 3  ;;  %p1193_p8 = pnand %p1192_p6, %p1401_p4 }
  0x79   : > { %v1582_v56 = vld [vmem:[%s1456_s22 + $0xe8] sm:$0xff]  ;;  %v1586_v58 = vld [vmem:[%s1456_s22 + $0xf0] sm:$0xff]  ;;  %v1590_v60 = vld [vmem:[%s1456_s22 + $0xf8] sm:$0xff]  ;;  %s1028_s30 = smul.u32 480, %s2071_s29  ;;  %s1197_s7 = scalar_lea.vmem %s1196_s20, 15360 }
  0x7a   : > { %v281_v13 = vadd.f32 %v280_v11, %v1490_v10  ;;  %v1594_v62 = vld [vmem:[%s1456_s22 + $0x100] sm:$0xff]  ;;  %v1598_v3 = vld [vmem:[%s1456_s22 + $0x108] sm:$0xff]  ;;  %v1602_v7 = vld [vmem:[%s1456_s22 + $0x110] sm:$0xff]  ;;  %p1194_p13 = pneg %p1193_p8  ;;  %p1198_p3 = scmp.lt.s32.totalorder %s2749_s25, %s1196_s20 }
  0x7b   : > { %v1606_v11 = vld [vmem:[%s1456_s22 + $0x118] sm:$0xff]  ;;  %s2076_s23 = scalar_lea.vmem [#allocation5], %s1028_s30  ;;  %s2482_s5 = scalar_lea.vmem [#allocation7], %s1028_s30 }
  0x7c   : > { %v282_v15 = vadd.f32 %v281_v13, %v1494_v12  ;;  %p1199_p7 = scmp.lt.s32.totalorder %s1197_s7, %s1191_s16 }
  0x7e   : > { %v283_v17 = vadd.f32 %v282_v15, %v1498_v14  ;;  %v1610_v15 = vld [vmem:[%s1456_s22 + $0x120] sm:$0xff]  ;;  %p1200_p9 = por %p1199_p7, %p1198_p3 }
  0x80   : > { %v284_v19 = vadd.f32 %v283_v17, %v1502_v16  ;;  %p1201_p12 = pnand %p1200_p9, %p1194_p13 }
  0x82   : > { %v285_v21 = vadd.f32 %v284_v19, %v1506_v18  ;;  %v1614_v19 = vld [vmem:[%s1456_s22 + $0x128] sm:$0xff] }
  0x84   : > { %v286_v23 = vadd.f32 %v285_v21, %v1510_v20 }
  0x86   : > { %v287_v25 = vadd.f32 %v286_v23, %v1514_v22  ;;  %v1618_v23 = vld [vmem:[%s1456_s22 + $0x130] sm:$0xff] }
  0x88   : > { %v288_v27 = vadd.f32 %v287_v25, %v1518_v24 }
  0x8a   : > { %v289_v29 = vadd.f32 %v288_v27, %v1522_v26  ;;  %v1622_v27 = vld [vmem:[%s1456_s22 + $0x138] sm:$0xff] }
  0x8c   : > { %v290_v31 = vadd.f32 %v289_v29, %v1526_v28 }
  0x8e   : > { %v291_v33 = vadd.f32 %v290_v31, %v1530_v30  ;;  %v1626_v31 = vld [vmem:[%s1456_s22 + $0x140] sm:$0xff] }
  0x90   : > { %v292_v35 = vadd.f32 %v291_v33, %v1534_v32 }
  0x92   : > { %v293_v37 = vadd.f32 %v292_v35, %v1538_v34  ;;  %v1630_v35 = vld [vmem:[%s1456_s22 + $0x148] sm:$0xff] }
  0x94   : > { %v294_v39 = vadd.f32 %v293_v37, %v1542_v36 }
  0x96   : > { %v295_v41 = vadd.f32 %v294_v39, %v1546_v38  ;;  %v1634_v39 = vld [vmem:[%s1456_s22 + $0x150] sm:$0xff] }
  0x98   : > { %v296_v43 = vadd.f32 %v295_v41, %v1550_v40 }
  0x9a   : > { %v297_v45 = vadd.f32 %v296_v43, %v1554_v42  ;;  %v1638_v43 = vld [vmem:[%s1456_s22 + $0x158] sm:$0xff] }
  0x9c   : > { %v298_v47 = vadd.f32 %v297_v45, %v1558_v44 }
  0x9e   : > { %v299_v49 = vadd.f32 %v298_v47, %v1562_v46  ;;  %v1642_v47 = vld [vmem:[%s1456_s22 + $0x160] sm:$0xff] }
  0xa0   : > { %v300_v51 = vadd.f32 %v299_v49, %v1566_v48 }
  0xa2   : > { %v301_v53 = vadd.f32 %v300_v51, %v1570_v50  ;;  %v1646_v51 = vld [vmem:[%s1456_s22 + $0x168] sm:$0xff] }
  0xa4   : > { %v302_v55 = vadd.f32 %v301_v53, %v1574_v52 }
  0xa6   : > { %v303_v57 = vadd.f32 %v302_v55, %v1578_v54  ;;  %v1650_v55 = vld [vmem:[%s1456_s22 + $0x170] sm:$0xff] }
  0xa8   : > { %v304_v59 = vadd.f32 %v303_v57, %v1582_v56 }
  0xaa   : > { %v305_v61 = vadd.f32 %v304_v59, %v1586_v58  ;;  %v1654_v59 = vld [vmem:[%s1456_s22 + $0x178] sm:$0xff] }
  0xac   : > { %v306_v63 = vadd.f32 %v305_v61, %v1590_v60 }
  0xae   : > { %v307_v5 = vadd.f32 %v306_v63, %v1594_v62  ;;  %v1658_v63 = vld [vmem:[%s1456_s22 + $0x180] sm:$0xff] }
  0xb0   : > { %v308_v9 = vadd.f32 %v307_v5, %v1598_v3 }
  0xb2   : > { %v309_v13 = vadd.f32 %v308_v9, %v1602_v7  ;;  %v1662_v9 = vld [vmem:[%s1456_s22 + $0x188] sm:$0xff] }
  0xb4   : > { %v310_v17 = vadd.f32 %v309_v13, %v1606_v11 }
  0xb6   : > { %v311_v21 = vadd.f32 %v310_v17, %v1610_v15  ;;  %v1666_v17 = vld [vmem:[%s1456_s22 + $0x190] sm:$0xff] }
  0xb8   : > { %v312_v25 = vadd.f32 %v311_v21, %v1614_v19 }
  0xba   : > { %v313_v29 = vadd.f32 %v312_v25, %v1618_v23  ;;  %v1670_v25 = vld [vmem:[%s1456_s22 + $0x198] sm:$0xff] }
  0xbb   : > { %2866 = vst [vmem:[#allocation12_spill] sm:$0xff] %v1670_v25 }
  0xbc   : > { %v314_v33 = vadd.f32 %v313_v29, %v1622_v27 }
  0xbe   : > { %v315_v37 = vadd.f32 %v314_v33, %v1626_v31  ;;  %v1674_v33 = vld [vmem:[%s1456_s22 + $0x1a0] sm:$0xff] }
  0xbf   : > { %2867 = vst [vmem:[#allocation13_spill] sm:$0xff] %v1674_v33 }
  0xc0   : > { %v316_v41 = vadd.f32 %v315_v37, %v1630_v35 }
  0xc2   : > { %v317_v45 = vadd.f32 %v316_v41, %v1634_v39  ;;  %v1678_v41 = vld [vmem:[%s1456_s22 + $0x1a8] sm:$0xff] }
  0xc3   : > { %2868 = vst [vmem:[#allocation14_spill] sm:$0xff] %v1678_v41 }
  0xc4   : > { %v318_v49 = vadd.f32 %v317_v45, %v1638_v43 }
  0xc6   : > { %v319_v53 = vadd.f32 %v318_v49, %v1642_v47  ;;  %v1682_v49 = vld [vmem:[%s1456_s22 + $0x1b0] sm:$0xff] }
  0xc7   : > { %2869 = vst [vmem:[#allocation15_spill] sm:$0xff] %v1682_v49 }
  0xc8   : > { %v320_v57 = vadd.f32 %v319_v53, %v1646_v51 }
  0xca   : > { %v321_v61 = vadd.f32 %v320_v57, %v1650_v55  ;;  %v1686_v57 = vld [vmem:[%s1456_s22 + $0x1b8] sm:$0xff] }
  0xcc   : > { %v322_v5 = vadd.f32 %v321_v61, %v1654_v59 }
  0xce   : > { %v323_v13 = vadd.f32 %v322_v5, %v1658_v63  ;;  %v1690_v5 = vld [vmem:[%s1456_s22 + $0x1c0] sm:$0xff] }
  0xd0   : > { %v324_v21 = vadd.f32 %v323_v13, %v1662_v9 }
  0xd2   : > { %v325_v29 = vadd.f32 %v324_v21, %v1666_v17  ;;  %v1694_v21 = vld [vmem:[%s1456_s22 + $0x1c8] sm:$0xff] }
  0xd4   : > { %v326_v37 = vadd.f32 %v325_v29, %v1670_v25  ;;  %v1698_v25 = vld [vmem:[%s1456_s22 + $0x1d0] sm:$0xff] }
  0xd6   : > { %v327_v45 = vadd.f32 %v326_v37, %v1674_v33  ;;  %v1702_v33 = vld [vmem:[%s1456_s22 + $0x1d8] sm:$0xff]  ;;  %s903_s22 = scalar_lea.sflag [#allocation4], %s1450_s17 }
  0xd7   : > { %2870 = vst [vmem:[#allocation16_spill] sm:$0xff] %v1702_v33 }
  0xd8   : > { %v328_v53 = vadd.f32 %v327_v45, %v1678_v41 }
  0xda   : > { %v329_v61 = vadd.f32 %v328_v53, %v1682_v49 }
  0xdc   : > { %v330_v13 = vadd.f32 %v329_v61, %v1686_v57 }
  0xde   : > { %v331_v29 = vadd.f32 %v330_v13, %v1690_v5 }
  0xe0   : > { %v332_v37 = vadd.f32 %v331_v29, %v1694_v21 }
  0xe2   : > { %v333_v45 = vadd.f32 %v332_v37, %v1698_v25 }
  0xe4   : > { %v334_v41 = vadd.f32 %v333_v45, %v1702_v33 }
  0xe6   : > { %335 = vadd.xlane.f32.xlu0 %v334_v41 }
 0x173   : > { %v336_v53 = vpop.xlane.xlu0 %335 }
 0x174   : > { %v1706_v49 = vmul.f32 0.00013020834, %v336_v53 }
 0x176   : > { %v1710_v61 = vsub.f32 %v1467_v0, %v1706_v49  ;;  %v1714_v13 = vsub.f32 %v1470_v1, %v1706_v49  ;;  %v1718_v29 = vsub.f32 %v1473_v2, %v1706_v49  ;;  %v1726_v45 = vsub.f32 %v1478_v4, %v1706_v49 }
 0x177   : > { %v1730_v0 = vsub.f32 %v1482_v6, %v1706_v49  ;;  %v1736_v2 = vsub.f32 %v1486_v8, %v1706_v49  ;;  %v1742_v4 = vsub.f32 %v1490_v10, %v1706_v49 }
 0x178   : > { %2871 = vst [vmem:[#allocation17_spill] sm:$0xff] %v1710_v61  ;;  %2872 = vst [vmem:[#allocation18_spill] sm:$0xff] %v1714_v13  ;;  %v398_v37 = vmul.f32 %v1710_v61, %v1710_v61  ;;  %v399_v41 = vmul.f32 %v1714_v13, %v1714_v13  ;;  %v400_v1 = vmul.f32 %v1718_v29, %v1718_v29 }
 0x179   : > { %2873 = vst [vmem:[#allocation19_spill] sm:$0xff] %v1718_v29  ;;  %v401_v61 = vmul.f32 %v1726_v45, %v1726_v45  ;;  %v402_v6 = vmul.f32 %v1730_v0, %v1730_v0  ;;  %v1748_v29 = vsub.f32 %v1494_v12, %v1706_v49  ;;  %v403_v8 = vmul.f32 %v1736_v2, %v1736_v2 }
 0x17a   : > { %v458_v53 = vadd.f32 %v399_v41, %v398_v37  ;;  %v1754_v41 = vsub.f32 %v1498_v14, %v1706_v49  ;;  %v404_v10 = vmul.f32 %v1742_v4, %v1742_v4 }
 0x17b   : > { %v405_v12 = vmul.f32 %v1748_v29, %v1748_v29 }
 0x17c   : > { %v459_v13 = vadd.f32 %v458_v53, %v400_v1  ;;  %v1760_v53 = vsub.f32 %v1502_v16, %v1706_v49  ;;  %v406_v14 = vmul.f32 %v1754_v41, %v1754_v41 }
 0x17e   : > { %v460_v33 = vadd.f32 %v459_v13, %v401_v61  ;;  %v1766_v13 = vsub.f32 %v1506_v18, %v1706_v49  ;;  %v407_v16 = vmul.f32 %v1760_v53, %v1760_v53 }
 0x180   : > { %v461_v37 = vadd.f32 %v460_v33, %v402_v6  ;;  %v1772_v6 = vsub.f32 %v1510_v20, %v1706_v49  ;;  %v408_v18 = vmul.f32 %v1766_v13, %v1766_v13 }
 0x182   : > { %v462_v1 = vadd.f32 %v461_v37, %v403_v8  ;;  %v1778_v37 = vsub.f32 %v1514_v22, %v1706_v49  ;;  %v409_v20 = vmul.f32 %v1772_v6, %v1772_v6 }
 0x184   : > { %v463_v61 = vadd.f32 %v462_v1, %v404_v10  ;;  %v1784_v1 = vsub.f32 %v1518_v24, %v1706_v49  ;;  %v410_v22 = vmul.f32 %v1778_v37, %v1778_v37 }
 0x186   : > { %v464_v33 = vadd.f32 %v463_v61, %v405_v12  ;;  %v1790_v61 = vsub.f32 %v1522_v26, %v1706_v49  ;;  %v411_v24 = vmul.f32 %v1784_v1, %v1784_v1 }
 0x188   : > { %v465_v8 = vadd.f32 %v464_v33, %v406_v14  ;;  %v1796_v33 = vsub.f32 %v1526_v28, %v1706_v49  ;;  %v412_v26 = vmul.f32 %v1790_v61, %v1790_v61 }
 0x18a   : > { %v466_v10 = vadd.f32 %v465_v8, %v407_v16  ;;  %v1802_v8 = vsub.f32 %v1530_v30, %v1706_v49  ;;  %v413_v28 = vmul.f32 %v1796_v33, %v1796_v33 }
 0x18c   : > { %v467_v12 = vadd.f32 %v466_v10, %v408_v18  ;;  %v1808_v10 = vsub.f32 %v1534_v32, %v1706_v49  ;;  %v414_v30 = vmul.f32 %v1802_v8, %v1802_v8 }
 0x18e   : > { %v468_v14 = vadd.f32 %v467_v12, %v409_v20  ;;  %v1814_v12 = vsub.f32 %v1538_v34, %v1706_v49  ;;  %v415_v32 = vmul.f32 %v1808_v10, %v1808_v10 }
 0x190   : > { %v469_v16 = vadd.f32 %v468_v14, %v410_v22  ;;  %2874 = vst [vmem:[#allocation20_spill] sm:$0xff] %v1814_v12  ;;  %v1820_v14 = vsub.f32 %v1542_v36, %v1706_v49  ;;  %v416_v34 = vmul.f32 %v1814_v12, %v1814_v12 }
 0x192   : > { %v470_v18 = vadd.f32 %v469_v16, %v411_v24  ;;  %2875 = vst [vmem:[#allocation21_spill] sm:$0xff] %v1820_v14  ;;  %v1826_v16 = vsub.f32 %v1546_v38, %v1706_v49  ;;  %v417_v36 = vmul.f32 %v1820_v14, %v1820_v14 }
 0x194   : > { %v471_v20 = vadd.f32 %v470_v18, %v412_v26  ;;  %2876 = vst [vmem:[#allocation22_spill] sm:$0xff] %v1826_v16  ;;  %v1832_v18 = vsub.f32 %v1550_v40, %v1706_v49  ;;  %v418_v38 = vmul.f32 %v1826_v16, %v1826_v16  ;;  %v581_v16 = vld [vmem:[%s2076_s23 + $0x148] sm:$0xff] }
 0x196   : > { %v472_v22 = vadd.f32 %v471_v20, %v413_v28  ;;  %2877 = vst [vmem:[#allocation23_spill] sm:$0xff] %v1832_v18  ;;  %v1838_v20 = vsub.f32 %v1554_v42, %v1706_v49  ;;  %v419_v40 = vmul.f32 %v1832_v18, %v1832_v18  ;;  %v580_v18 = vld [vmem:[%s2076_s23 + $0x140] sm:$0xff] }
 0x198   : > { %v473_v24 = vadd.f32 %v472_v22, %v414_v30  ;;  %2878 = vst [vmem:[#allocation24_spill] sm:$0xff] %v1838_v20  ;;  %v1844_v22 = vsub.f32 %v1558_v44, %v1706_v49  ;;  %v420_v42 = vmul.f32 %v1838_v20, %v1838_v20 }
 0x19a   : > { %v474_v26 = vadd.f32 %v473_v24, %v415_v32  ;;  %2879 = vst [vmem:[#allocation25_spill] sm:$0xff] %v1844_v22  ;;  %v1850_v24 = vsub.f32 %v1562_v46, %v1706_v49  ;;  %v421_v44 = vmul.f32 %v1844_v22, %v1844_v22  ;;  %v578_v22 = vld [vmem:[%s2076_s23 + $0x130] sm:$0xff] }
 0x19c   : > { %v475_v28 = vadd.f32 %v474_v26, %v416_v34  ;;  %2880 = vst [vmem:[#allocation26_spill] sm:$0xff] %v1850_v24  ;;  %v1856_v26 = vsub.f32 %v1566_v48, %v1706_v49  ;;  %v422_v46 = vmul.f32 %v1850_v24, %v1850_v24  ;;  %v577_v24 = vld [vmem:[%s2076_s23 + $0x128] sm:$0xff] }
 0x19e   : > { %v476_v30 = vadd.f32 %v475_v28, %v417_v36  ;;  %2881 = vst [vmem:[#allocation27_spill] sm:$0xff] %v1856_v26  ;;  %v1862_v28 = vsub.f32 %v1570_v50, %v1706_v49  ;;  %v423_v48 = vmul.f32 %v1856_v26, %v1856_v26 }
 0x1a0   : > { %v477_v32 = vadd.f32 %v476_v30, %v418_v38  ;;  %2882 = vst [vmem:[#allocation28_spill] sm:$0xff] %v1862_v28  ;;  %v1868_v30 = vsub.f32 %v1574_v52, %v1706_v49  ;;  %v424_v50 = vmul.f32 %v1862_v28, %v1862_v28  ;;  %v575_v28 = vld [vmem:[%s2076_s23 + $0x118] sm:$0xff] }
 0x1a2   : > { %v478_v34 = vadd.f32 %v477_v32, %v419_v40  ;;  %2883 = vst [vmem:[#allocation29_spill] sm:$0xff] %v1868_v30  ;;  %v1874_v32 = vsub.f32 %v1578_v54, %v1706_v49  ;;  %v425_v52 = vmul.f32 %v1868_v30, %v1868_v30  ;;  %v574_v30 = vld [vmem:[%s2076_s23 + $0x110] sm:$0xff] }
 0x1a4   : > { %v479_v36 = vadd.f32 %v478_v34, %v420_v42  ;;  %2884 = vst [vmem:[#allocation30_spill] sm:$0xff] %v1874_v32  ;;  %v1880_v34 = vsub.f32 %v1582_v56, %v1706_v49  ;;  %v426_v54 = vmul.f32 %v1874_v32, %v1874_v32  ;;  %v573_v32 = vld [vmem:[%s2076_s23 + $0x108] sm:$0xff] }
 0x1a6   : > { %v480_v38 = vadd.f32 %v479_v36, %v421_v44  ;;  %2885 = vst [vmem:[#allocation31_spill] sm:$0xff] %v1880_v34  ;;  %v1886_v36 = vsub.f32 %v1586_v58, %v1706_v49  ;;  %v427_v56 = vmul.f32 %v1880_v34, %v1880_v34 }
 0x1a8   : > { %v481_v40 = vadd.f32 %v480_v38, %v422_v46  ;;  %2886 = vst [vmem:[#allocation32_spill] sm:$0xff] %v1886_v36  ;;  %v1892_v38 = vsub.f32 %v1590_v60, %v1706_v49  ;;  %v428_v58 = vmul.f32 %v1886_v36, %v1886_v36  ;;  %v571_v36 = vld [vmem:[%s2076_s23 + $0xf8] sm:$0xff] }
 0x1aa   : > { %v482_v42 = vadd.f32 %v481_v40, %v423_v48  ;;  %2887 = vst [vmem:[#allocation33_spill] sm:$0xff] %v1892_v38  ;;  %v1898_v40 = vsub.f32 %v1594_v62, %v1706_v49  ;;  %v429_v60 = vmul.f32 %v1892_v38, %v1892_v38  ;;  %v570_v38 = vld [vmem:[%s2076_s23 + $0xf0] sm:$0xff] }
 0x1ac   : > { %v483_v44 = vadd.f32 %v482_v42, %v424_v50  ;;  %2888 = vst [vmem:[#allocation34_spill] sm:$0xff] %v1898_v40  ;;  %v1904_v42 = vsub.f32 %v1598_v3, %v1706_v49  ;;  %v430_v62 = vmul.f32 %v1898_v40, %v1898_v40  ;;  %v569_v40 = vld [vmem:[%s2076_s23 + $0xe8] sm:$0xff] }
 0x1ae   : > { %v484_v46 = vadd.f32 %v483_v44, %v425_v52  ;;  %2889 = vst [vmem:[#allocation35_spill] sm:$0xff] %v1904_v42  ;;  %v1910_v44 = vsub.f32 %v1602_v7, %v1706_v49  ;;  %v431_v3 = vmul.f32 %v1904_v42, %v1904_v42  ;;  %v568_v42 = vld [vmem:[%s2076_s23 + $0xe0] sm:$0xff] }
 0x1b0   : > { %v485_v48 = vadd.f32 %v484_v46, %v426_v54  ;;  %2890 = vst [vmem:[#allocation36_spill] sm:$0xff] %v1910_v44  ;;  %v1916_v46 = vsub.f32 %v1606_v11, %v1706_v49  ;;  %v432_v7 = vmul.f32 %v1910_v44, %v1910_v44  ;;  %v567_v44 = vld [vmem:[%s2076_s23 + $0xd8] sm:$0xff] }
 0x1b2   : > { %v486_v50 = vadd.f32 %v485_v48, %v427_v56  ;;  %2891 = vst [vmem:[#allocation37_spill] sm:$0xff] %v1916_v46  ;;  %v1922_v48 = vsub.f32 %v1610_v15, %v1706_v49  ;;  %v433_v11 = vmul.f32 %v1916_v46, %v1916_v46  ;;  %v566_v46 = vld [vmem:[%s2076_s23 + $0xd0] sm:$0xff] }
 0x1b4   : > { %v487_v52 = vadd.f32 %v486_v50, %v428_v58  ;;  %2892 = vst [vmem:[#allocation38_spill] sm:$0xff] %v1922_v48  ;;  %v1928_v50 = vsub.f32 %v1614_v19, %v1706_v49  ;;  %v434_v15 = vmul.f32 %v1922_v48, %v1922_v48  ;;  %v565_v48 = vld [vmem:[%s2076_s23 + $0xc8] sm:$0xff] }
 0x1b6   : > { %v488_v54 = vadd.f32 %v487_v52, %v429_v60  ;;  %2893 = vst [vmem:[#allocation39_spill] sm:$0xff] %v1928_v50  ;;  %v1934_v52 = vsub.f32 %v1618_v23, %v1706_v49  ;;  %v435_v19 = vmul.f32 %v1928_v50, %v1928_v50  ;;  %v564_v50 = vld [vmem:[%s2076_s23 + $0xc0] sm:$0xff] }
 0x1b8   : > { %v489_v56 = vadd.f32 %v488_v54, %v430_v62  ;;  %2894 = vst [vmem:[#allocation40_spill] sm:$0xff] %v1934_v52  ;;  %v1940_v54 = vsub.f32 %v1622_v27, %v1706_v49  ;;  %v436_v23 = vmul.f32 %v1934_v52, %v1934_v52 }
 0x1ba   : > { %v490_v58 = vadd.f32 %v489_v56, %v431_v3  ;;  %2895 = vst [vmem:[#allocation41_spill] sm:$0xff] %v1940_v54  ;;  %v1946_v56 = vsub.f32 %v1626_v31, %v1706_v49  ;;  %v437_v27 = vmul.f32 %v1940_v54, %v1940_v54 }
 0x1bc   : > { %v491_v60 = vadd.f32 %v490_v58, %v432_v7  ;;  %2896 = vst [vmem:[#allocation42_spill] sm:$0xff] %v1946_v56  ;;  %v1952_v58 = vsub.f32 %v1630_v35, %v1706_v49  ;;  %v438_v31 = vmul.f32 %v1946_v56, %v1946_v56 }
 0x1be   : > { %v492_v62 = vadd.f32 %v491_v60, %v433_v11  ;;  %2897 = vst [vmem:[#allocation43_spill] sm:$0xff] %v1952_v58  ;;  %v1958_v60 = vsub.f32 %v1634_v39, %v1706_v49  ;;  %v439_v35 = vmul.f32 %v1952_v58, %v1952_v58 }
 0x1c0   : > { %v493_v3 = vadd.f32 %v492_v62, %v434_v15  ;;  %2898 = vst [vmem:[#allocation44_spill] sm:$0xff] %v1958_v60  ;;  %v1964_v62 = vsub.f32 %v1638_v43, %v1706_v49  ;;  %v440_v39 = vmul.f32 %v1958_v60, %v1958_v60  ;;  %v563_v60 = vld [vmem:[%s2076_s23 + $0xb8] sm:$0xff] }
 0x1c2   : > { %v494_v7 = vadd.f32 %v493_v3, %v435_v19  ;;  %2899 = vst [vmem:[#allocation45_spill] sm:$0xff] %v1964_v62  ;;  %v1970_v3 = vsub.f32 %v1642_v47, %v1706_v49  ;;  %v441_v43 = vmul.f32 %v1964_v62, %v1964_v62  ;;  %v562_v62 = vld [vmem:[%s2076_s23 + $0xb0] sm:$0xff] }
 0x1c4   : > { %v495_v11 = vadd.f32 %v494_v7, %v436_v23  ;;  %2900 = vst [vmem:[#allocation46_spill] sm:$0xff] %v1970_v3  ;;  %v1976_v7 = vsub.f32 %v1646_v51, %v1706_v49  ;;  %v442_v47 = vmul.f32 %v1970_v3, %v1970_v3  ;;  %v561_v3 = vld [vmem:[%s2076_s23 + $0xa8] sm:$0xff] }
 0x1c6   : > { %v496_v15 = vadd.f32 %v495_v11, %v437_v27  ;;  %2901 = vst [vmem:[#allocation47_spill] sm:$0xff] %v1976_v7  ;;  %v1982_v11 = vsub.f32 %v1650_v55, %v1706_v49  ;;  %v443_v51 = vmul.f32 %v1976_v7, %v1976_v7  ;;  %v560_v7 = vld [vmem:[%s2076_s23 + $0xa0] sm:$0xff] }
 0x1c8   : > { %v497_v19 = vadd.f32 %v496_v15, %v438_v31  ;;  %2902 = vst [vmem:[#allocation48_spill] sm:$0xff] %v1982_v11  ;;  %v1988_v15 = vsub.f32 %v1654_v59, %v1706_v49  ;;  %v444_v55 = vmul.f32 %v1982_v11, %v1982_v11 }
 0x1ca   : > { %v498_v23 = vadd.f32 %v497_v19, %v439_v35  ;;  %2903 = vst [vmem:[#allocation49_spill] sm:$0xff] %v1988_v15  ;;  %v1994_v19 = vsub.f32 %v1658_v63, %v1706_v49  ;;  %v445_v59 = vmul.f32 %v1988_v15, %v1988_v15 }
 0x1cc   : > { %v499_v27 = vadd.f32 %v498_v23, %v440_v39  ;;  %2904 = vst [vmem:[#allocation50_spill] sm:$0xff] %v1994_v19  ;;  %v2000_v23 = vsub.f32 %v1662_v9, %v1706_v49  ;;  %v446_v63 = vmul.f32 %v1994_v19, %v1994_v19 }
 0x1ce   : > { %v500_v31 = vadd.f32 %v499_v27, %v441_v43  ;;  %2905 = vst [vmem:[#allocation51_spill] sm:$0xff] %v2000_v23  ;;  %v2006_v27 = vsub.f32 %v1666_v17, %v1706_v49  ;;  %v447_v9 = vmul.f32 %v2000_v23, %v2000_v23 }
 0x1d0   : > { %v501_v35 = vadd.f32 %v500_v31, %v442_v47  ;;  %2906 = vst [vmem:[#allocation52_spill] sm:$0xff] %v2006_v27  ;;  %v2907_v31 = vld [vmem:[#allocation12_spill] sm:$0xff]  ;;  %v448_v17 = vmul.f32 %v2006_v27, %v2006_v27  ;;  %v559_v27 = vld [vmem:[%s2076_s23 + $0x98] sm:$0xff] }
 0x1d1   : > { %v2012_v11 = vsub.f32 %v2907_v31, %v1706_v49  ;;  %v2913_v31 = vld [vmem:[#allocation15_spill] sm:$0xff] }
 0x1d2   : > { %v502_v39 = vadd.f32 %v501_v35, %v443_v51  ;;  %v2909_v35 = vld [vmem:[#allocation13_spill] sm:$0xff]  ;;  %v2030_v23 = vsub.f32 %v2913_v31, %v1706_v49  ;;  %v2054_v31 = vsub.f32 %v1698_v25, %v1706_v49 }
 0x1d3   : > { %2908 = vst [vmem:[#allocation12_spill] sm:$0xff] %v2012_v11  ;;  %v2018_v15 = vsub.f32 %v2909_v35, %v1706_v49  ;;  %v2036_v35 = vsub.f32 %v1686_v57, %v1706_v49 }
 0x1d4   : > { %v503_v43 = vadd.f32 %v502_v39, %v444_v55  ;;  %v2911_v39 = vld [vmem:[#allocation14_spill] sm:$0xff]  ;;  %2914 = vst [vmem:[#allocation15_spill] sm:$0xff] %v2030_v23  ;;  %2918 = vst [vmem:[#allocation56_spill] sm:$0xff] %v2054_v31 }
 0x1d5   : > { %2910 = vst [vmem:[#allocation13_spill] sm:$0xff] %v2018_v15  ;;  %v2024_v19 = vsub.f32 %v2911_v39, %v1706_v49  ;;  %2915 = vst [vmem:[#allocation53_spill] sm:$0xff] %v2036_v35  ;;  %v2042_v39 = vsub.f32 %v1690_v5, %v1706_v49  ;;  %v453_v57 = vmul.f32 %v2036_v35, %v2036_v35 }
 0x1d6   : > { %v504_v47 = vadd.f32 %v503_v43, %v445_v59  ;;  %v449_v59 = vmul.f32 %v2012_v11, %v2012_v11  ;;  %v558_v11 = vld [vmem:[%s2076_s23 + $0x90] sm:$0xff] }
 0x1d7   : > { %2912 = vst [vmem:[#allocation14_spill] sm:$0xff] %v2024_v19  ;;  %2916 = vst [vmem:[#allocation54_spill] sm:$0xff] %v2042_v39  ;;  %v454_v5 = vmul.f32 %v2042_v39, %v2042_v39 }
 0x1d8   : > { %v505_v51 = vadd.f32 %v504_v47, %v446_v63  ;;  %v450_v63 = vmul.f32 %v2018_v15, %v2018_v15  ;;  %v557_v15 = vld [vmem:[%s2076_s23 + $0x88] sm:$0xff] }
 0x1da   : > { %v506_v55 = vadd.f32 %v505_v51, %v447_v9  ;;  %v451_v9 = vmul.f32 %v2024_v19, %v2024_v19  ;;  %v556_v19 = vld [vmem:[%s2076_s23 + $0x80] sm:$0xff] }
 0x1dc   : > { %v507_v43 = vadd.f32 %v506_v55, %v448_v17  ;;  %v452_v17 = vmul.f32 %v2030_v23, %v2030_v23 }
 0x1de   : > { %v508_v47 = vadd.f32 %v507_v43, %v449_v59  ;;  %v2048_v59 = vsub.f32 %v1694_v21, %v1706_v49 }
 0x1e0   : > { %v509_v51 = vadd.f32 %v508_v47, %v450_v63  ;;  %2917 = vst [vmem:[#allocation55_spill] sm:$0xff] %v2048_v59  ;;  %v2919_v47 = vld [vmem:[#allocation16_spill] sm:$0xff]  ;;  %v455_v21 = vmul.f32 %v2048_v59, %v2048_v59  ;;  %v555_v59 = vld [vmem:[%s2076_s23 + $0x78] sm:$0xff] }
 0x1e2   : > { %v510_v55 = vadd.f32 %v509_v51, %v451_v9  ;;  %v2060_v9 = vsub.f32 %v2919_v47, %v1706_v49  ;;  %v544_v47 = vld [vmem:[%s2076_s23 + $0x20] sm:$0xff] }
 0x1e4   : > { %v511_v43 = vadd.f32 %v510_v55, %v452_v17  ;;  %2920 = vst [vmem:[#allocation16_spill] sm:$0xff] %v2060_v9  ;;  %v456_v17 = vmul.f32 %v2054_v31, %v2054_v31  ;;  %v457_v25 = vmul.f32 %v2060_v9, %v2060_v9  ;;  %v553_v9 = vld [vmem:[%s2076_s23 + $0x68] sm:$0xff]  ;;  %v554_v31 = vld [vmem:[%s2076_s23 + $0x70] sm:$0xff] }
 0x1e6   : > { %v512_v63 = vadd.f32 %v511_v43, %v453_v57 }
 0x1e8   : > { %v513_v51 = vadd.f32 %v512_v63, %v454_v5  ;;  %v542_v5 = vld [vmem:[%s2076_s23 + $0x10] sm:$0xff]  ;;  %v543_v63 = vld [vmem:[%s2076_s23 + $0x18] sm:$0xff] }
 0x1ea   : > { %v514_v55 = vadd.f32 %v513_v51, %v455_v21  ;;  %v545_v21 = vld [vmem:[%s2076_s23 + $0x28] sm:$0xff]  ;;  %v546_v51 = vld [vmem:[%s2076_s23 + $0x30] sm:$0xff] }
 0x1ec   : > { %v515_v35 = vadd.f32 %v514_v55, %v456_v17  ;;  %v547_v17 = vld [vmem:[%s2076_s23 + $0x38] sm:$0xff]  ;;  %v548_v55 = vld [vmem:[%s2076_s23 + $0x40] sm:$0xff] }
 0x1ee   : > { %v516_v23 = vadd.f32 %v515_v35, %v457_v25  ;;  %v541_v35 = vld [vmem:[%s2076_s23 + $0x8] sm:$0xff] }
 0x1ef   : > { %v549_v25 = vld [vmem:[%s2076_s23 + $0x48] sm:$0xff] }
 0x1f0   : > { %517 = vadd.xlane.f32.xlu0 %v516_v23  ;;  %v540_v23 = vld [vmem:[%s2076_s23] sm:$0xff] }
 0x27d   : > { %v518_v49 = vpop.xlane.xlu0 %517 }
 0x27e   : > { %v519_v57 = vmul.f32 0.00013020834, %v518_v49  ;;  %v550_v49 = vld [vmem:[%s2076_s23 + $0x50] sm:$0xff] }
 0x280   : > { %v520_v43 = vadd.f32 1e-05, %v519_v57  ;;  %v551_v57 = vld [vmem:[%s2076_s23 + $0x58] sm:$0xff] }
 0x282   : > { %1103 = vrsqrt.f32 %v520_v43  ;;  %v552_v43 = vld [vmem:[%s2076_s23 + $0x60] sm:$0xff] }
 0x28c   : > { %v2094_v39 = vpop.eup %1103 }
 0x28d   : > { %v2105_v58 = vmul.f32 %v2094_v39, %v540_v23  ;;  %v2108_v56 = vmul.f32 %v2094_v39, %v541_v35  ;;  %v2111_v54 = vmul.f32 %v2094_v39, %v542_v5  ;;  %v2114_v52 = vmul.f32 %v2094_v39, %v543_v63 }
 0x28e   : > { %v2121_v23 = vmul.f32 %v2094_v39, %v544_v47  ;;  %v2124_v35 = vmul.f32 %v2094_v39, %v545_v21  ;;  %v2127_v5 = vmul.f32 %v2094_v39, %v546_v51  ;;  %v2130_v63 = vmul.f32 %v2094_v39, %v547_v17  ;;  %v572_v17 = vld [vmem:[%s2076_s23 + $0x100] sm:$0xff] }
 0x28f   : > { %v2137_v34 = vmul.f32 %v2094_v39, %v548_v55  ;;  %v2140_v47 = vmul.f32 %v2094_v39, %v549_v25  ;;  %v2143_v21 = vmul.f32 %v2094_v39, %v550_v49  ;;  %v2146_v51 = vmul.f32 %v2094_v39, %v551_v57  ;;  %v576_v57 = vld [vmem:[%s2076_s23 + $0x120] sm:$0xff] }
 0x290   : > { %v2153_v26 = vmul.f32 %v2094_v39, %v552_v43  ;;  %v2156_v55 = vmul.f32 %v2094_v39, %v553_v9  ;;  %v2159_v25 = vmul.f32 %v2094_v39, %v554_v31  ;;  %v2162_v49 = vmul.f32 %v2094_v39, %v555_v59  ;;  %v579_v59 = vld [vmem:[%s2076_s23 + $0x138] sm:$0xff] }
 0x291   : > { %v2168_v20 = vmul.f32 %v2094_v39, %v556_v19  ;;  %v2171_v43 = vmul.f32 %v2094_v39, %v557_v15  ;;  %v2174_v9 = vmul.f32 %v2094_v39, %v558_v11  ;;  %v2177_v31 = vmul.f32 %v2094_v39, %v559_v27  ;;  %v582_v27 = vld [vmem:[%s2076_s23 + $0x150] sm:$0xff] }
 0x292   : > { %v2183_v14 = vmul.f32 %v2094_v39, %v560_v7  ;;  %v2186_v19 = vmul.f32 %v2094_v39, %v561_v3  ;;  %v2189_v15 = vmul.f32 %v2094_v39, %v562_v62  ;;  %v2192_v11 = vmul.f32 %v2094_v39, %v563_v60  ;;  %v585_v60 = vld [vmem:[%s2076_s23 + $0x168] sm:$0xff] }
 0x293   : > { %2921 = vst [vmem:[#allocation57_spill] sm:$0xff] %v2174_v9  ;;  %2922 = vst [vmem:[#allocation58_spill] sm:$0xff] %v2177_v31  ;;  %v583_v31 = vld [vmem:[%s2076_s23 + $0x158] sm:$0xff]  ;;  %v584_v9 = vld [vmem:[%s2076_s23 + $0x160] sm:$0xff]  ;;  %v2198_v12 = vmul.f32 %v2094_v39, %v564_v50  ;;  %v2201_v7 = vmul.f32 %v2094_v39, %v565_v48  ;;  %v2204_v3 = vmul.f32 %v2094_v39, %v566_v46 }
 0x294   : > { %2923 = vst [vmem:[#allocation59_spill] sm:$0xff] %v2186_v19  ;;  %2924 = vst [vmem:[#allocation60_spill] sm:$0xff] %v2189_v15  ;;  %v2207_v62 = vmul.f32 %v2094_v39, %v567_v44  ;;  %v587_v15 = vld [vmem:[%s2076_s23 + $0x178] sm:$0xff]  ;;  %v2213_v19 = vmul.f32 %v2094_v39, %v568_v42  ;;  %v2216_v50 = vmul.f32 %v2094_v39, %v569_v40  ;;  %v588_v44 = vld [vmem:[%s2076_s23 + $0x180] sm:$0xff] }
 0x295   : > { %2925 = vst [vmem:[#allocation61_spill] sm:$0xff] %v2192_v11  ;;  %2926 = vst [vmem:[#allocation62_spill] sm:$0xff] %v2201_v7  ;;  %v586_v11 = vld [vmem:[%s2076_s23 + $0x170] sm:$0xff]  ;;  %v2219_v48 = vmul.f32 %v2094_v39, %v570_v38  ;;  %v2222_v46 = vmul.f32 %v2094_v39, %v571_v36  ;;  %v2228_v7 = vmul.f32 %v2094_v39, %v572_v17  ;;  %v591_v36 = vld [vmem:[%s2076_s23 + $0x198] sm:$0xff] }
 0x296   : > { %2927 = vst [vmem:[#allocation63_spill] sm:$0xff] %v2204_v3  ;;  %2928 = vst [vmem:[#allocation64_spill] sm:$0xff] %v2207_v62  ;;  %v589_v62 = vld [vmem:[%s2076_s23 + $0x188] sm:$0xff]  ;;  %v590_v3 = vld [vmem:[%s2076_s23 + $0x190] sm:$0xff]  ;;  %v2231_v42 = vmul.f32 %v2094_v39, %v573_v32  ;;  %v2234_v40 = vmul.f32 %v2094_v39, %v574_v30  ;;  %v2237_v38 = vmul.f32 %v2094_v39, %v575_v28 }
 0x297   : > { %2929 = vst [vmem:[#allocation65_spill] sm:$0xff] %v2216_v50  ;;  %2930 = vst [vmem:[#allocation66_spill] sm:$0xff] %v2219_v48  ;;  %v593_v48 = vld [vmem:[%s2076_s23 + $0x1a8] sm:$0xff]  ;;  %v2243_v50 = vmul.f32 %v2094_v39, %v576_v57  ;;  %v2246_v17 = vmul.f32 %v2094_v39, %v577_v24  ;;  %v2249_v32 = vmul.f32 %v2094_v39, %v578_v22  ;;  %v595_v28 = vld [vmem:[%s2076_s23 + $0x1b8] sm:$0xff] }
 0x298   : > { %2931 = vst [vmem:[#allocation67_spill] sm:$0xff] %v2222_v46  ;;  %2932 = vst [vmem:[#allocation68_spill] sm:$0xff] %v2228_v7  ;;  %v592_v46 = vld [vmem:[%s2076_s23 + $0x1a0] sm:$0xff]  ;;  %v2252_v30 = vmul.f32 %v2094_v39, %v579_v59  ;;  %v2261_v7 = vmul.f32 %v2094_v39, %v581_v16  ;;  %v2264_v57 = vmul.f32 %v2094_v39, %v582_v27  ;;  %v597_v22 = vld [vmem:[%s2076_s23 + $0x1c8] sm:$0xff] }
 0x299   : > { %2933 = vst [vmem:[#allocation69_spill] sm:$0xff] %v2231_v42  ;;  %2934 = vst [vmem:[#allocation70_spill] sm:$0xff] %v2234_v40  ;;  %v594_v40 = vld [vmem:[%s2076_s23 + $0x1b0] sm:$0xff]  ;;  %v2258_v42 = vmul.f32 %v2094_v39, %v580_v18  ;;  %v2267_v24 = vmul.f32 %v2094_v39, %v583_v31  ;;  %v2273_v59 = vmul.f32 %v2094_v39, %v584_v9 }
 0x29a   : > { %2935 = vst [vmem:[#allocation71_spill] sm:$0xff] %v2237_v38  ;;  %2936 = vst [vmem:[#allocation72_spill] sm:$0xff] %v2246_v17  ;;  %v596_v38 = vld [vmem:[%s2076_s23 + $0x1c0] sm:$0xff]  ;;  %v599_v17 = vld [vmem:[%s2076_s23 + $0x1d8] sm:$0xff]  ;;  %v2279_v18 = vmul.f32 %v2094_v39, %v586_v11  ;;  %v2282_v16 = vmul.f32 %v2094_v39, %v587_v15  ;;  %v2285_v27 = vmul.f32 %v2094_v39, %v588_v44 }
 0x29b   : > { %2937 = vst [vmem:[#allocation73_spill] sm:$0xff] %v2249_v32  ;;  %2938 = vst [vmem:[#allocation74_spill] sm:$0xff] %v2252_v30  ;;  %v598_v32 = vld [vmem:[%s2076_s23 + $0x1d0] sm:$0xff]  ;;  %v2276_v30 = vmul.f32 %v2094_v39, %v585_v60  ;;  %v2288_v31 = vmul.f32 %v2094_v39, %v589_v62  ;;  %v2294_v9 = vmul.f32 %v2094_v39, %v591_v36 }
 0x29c   : > { %2939 = vst [vmem:[#allocation75_spill] sm:$0xff] %v2267_v24  ;;  %v2291_v24 = vmul.f32 %v2094_v39, %v590_v3  ;;  %v2297_v60 = vmul.f32 %v2094_v39, %v592_v46  ;;  %v2300_v11 = vmul.f32 %v2094_v39, %v593_v48  ;;  %v2303_v15 = vmul.f32 %v2094_v39, %v594_v40  ;;  %v2942_v48 = vld [vmem:[#allocation17_spill] sm:$0xff]  ;;  %v2943_v40 = vld [vmem:[#allocation18_spill] sm:$0xff] }
 0x29d   : > { %v2306_v44 = vmul.f32 %v2094_v39, %v595_v28  ;;  %v2309_v62 = vmul.f32 %v2094_v39, %v596_v38  ;;  %v2312_v3 = vmul.f32 %v2094_v39, %v597_v22  ;;  %v2315_v36 = vmul.f32 %v2094_v39, %v598_v32  ;;  %v2959_v32 = vld [vmem:[#allocation28_spill] sm:$0xff] }
 0x29e   : > { %2940 = vst [vmem:[#allocation76_spill] sm:$0xff] %v2300_v11  ;;  %v2318_v46 = vmul.f32 %v2094_v39, %v599_v17  ;;  %v2322_v11 = vmul.f32 %v2105_v58, %v2942_v48  ;;  %v2326_v28 = vmul.f32 %v2108_v56, %v2943_v40  ;;  %v2334_v22 = vmul.f32 %v2114_v52, %v1726_v45  ;;  %v2947_v52 = vld [vmem:[#allocation21_spill] sm:$0xff]  ;;  %v2958_v17 = vld [vmem:[#allocation62_spill] sm:$0xff] }
 0x29f   : > { %2941 = vst [vmem:[#allocation77_spill] sm:$0xff] %v2306_v44  ;;  %v2944_v44 = vld [vmem:[#allocation19_spill] sm:$0xff]  ;;  %v2338_v39 = vmul.f32 %v2121_v23, %v1730_v0  ;;  %v2342_v58 = vmul.f32 %v2124_v35, %v1736_v2  ;;  %v2346_v56 = vmul.f32 %v2127_v5, %v1742_v4  ;;  %v2354_v45 = vmul.f32 %v2137_v34, %v1754_v41  ;;  %v2946_v34 = vld [vmem:[#allocation57_spill] sm:$0xff]  ;;  %v2948_v23 = vld [vmem:[#allocation58_spill] sm:$0xff] }
 0x2a0   : > { %v2330_v38 = vmul.f32 %v2111_v54, %v2944_v44  ;;  %v2350_v54 = vmul.f32 %v2130_v63, %v1748_v29  ;;  %v2358_v0 = vmul.f32 %v2140_v47, %v1760_v53  ;;  %v2362_v2 = vmul.f32 %v2143_v21, %v1766_v13  ;;  %v2949_v35 = vld [vmem:[#allocation22_spill] sm:$0xff]  ;;  %v2950_v5 = vld [vmem:[#allocation23_spill] sm:$0xff]  ;;  %v2953_v47 = vld [vmem:[#allocation60_spill] sm:$0xff] }
 0x2a1   : > { %v2366_v4 = vmul.f32 %v2146_v51, %v1772_v6  ;;  %v2370_v29 = vmul.f32 %v2153_v26, %v1778_v37  ;;  %v2374_v41 = vmul.f32 %v2156_v55, %v1784_v1  ;;  %v2378_v53 = vmul.f32 %v2159_v25, %v1790_v61  ;;  %v2945_v26 = vld [vmem:[#allocation20_spill] sm:$0xff]  ;;  %v2951_v63 = vld [vmem:[#allocation59_spill] sm:$0xff]  ;;  %v2954_v21 = vld [vmem:[#allocation25_spill] sm:$0xff] }
 0x2a2   : > { %v2382_v13 = vmul.f32 %v2162_v49, %v1796_v33  ;;  %v2386_v6 = vmul.f32 %v2168_v20, %v1802_v8  ;;  %v2390_v37 = vmul.f32 %v2171_v43, %v1808_v10  ;;  %v2394_v1 = vmul.f32 %v2946_v34, %v2945_v26  ;;  %v2952_v20 = vld [vmem:[#allocation24_spill] sm:$0xff]  ;;  %v2955_v51 = vld [vmem:[#allocation61_spill] sm:$0xff]  ;;  %v2956_v25 = vld [vmem:[#allocation26_spill] sm:$0xff] }
 0x2a3   : > { %v2398_v61 = vmul.f32 %v2948_v23, %v2947_v52  ;;  %v2402_v33 = vmul.f32 %v2183_v14, %v2949_v35  ;;  %v2406_v8 = vmul.f32 %v2951_v63, %v2950_v5  ;;  %v2410_v10 = vmul.f32 %v2953_v47, %v2952_v20  ;;  %v2957_v43 = vld [vmem:[#allocation27_spill] sm:$0xff]  ;;  %v2961_v40 = vld [vmem:[#allocation29_spill] sm:$0xff]  ;;  %v2962_v26 = vld [vmem:[#allocation64_spill] sm:$0xff] }
 0x2a4   : > { %v2414_v55 = vmul.f32 %v2955_v51, %v2954_v21  ;;  %v2418_v49 = vmul.f32 %v2198_v12, %v2956_v25  ;;  %v2422_v14 = vmul.f32 %v2958_v17, %v2957_v43  ;;  %v2960_v44 = vld [vmem:[#allocation63_spill] sm:$0xff]  ;;  %v2430_v34 = vmul.f32 %v2962_v26, %v2961_v40  ;;  %v2963_v52 = vld [vmem:[#allocation30_spill] sm:$0xff]  ;;  %v2965_v12 = vld [vmem:[#allocation65_spill] sm:$0xff] }
 0x2a5   : > { %v2426_v48 = vmul.f32 %v2960_v44, %v2959_v32  ;;  %v2434_v23 = vmul.f32 %v2213_v19, %v2963_v52  ;;  %v2964_v35 = vld [vmem:[#allocation31_spill] sm:$0xff]  ;;  %v2967_v63 = vld [vmem:[#allocation32_spill] sm:$0xff]  ;;  %v2968_v20 = vld [vmem:[#allocation66_spill] sm:$0xff] }
 0x2a6   : > { %v2438_v5 = vmul.f32 %v2965_v12, %v2964_v35  ;;  %v2442_v47 = vmul.f32 %v2968_v20, %v2967_v63  ;;  %v2970_v21 = vld [vmem:[#allocation33_spill] sm:$0xff]  ;;  %v2971_v51 = vld [vmem:[#allocation67_spill] sm:$0xff]  ;;  %v2973_v43 = vld [vmem:[#allocation34_spill] sm:$0xff] }
 0x2a7   : > { %v2446_v25 = vmul.f32 %v2971_v51, %v2970_v21  ;;  %v2974_v17 = vld [vmem:[#allocation68_spill] sm:$0xff]  ;;  %v2976_v44 = vld [vmem:[#allocation35_spill] sm:$0xff]  ;;  %v2977_v40 = vld [vmem:[#allocation69_spill] sm:$0xff] }
 0x2a8   : > { %2966 = vst [vmem:[#allocation17_spill] sm:$0xff] %v2438_v5  ;;  %2969 = vst [vmem:[#allocation18_spill] sm:$0xff] %v2442_v47  ;;  %v2450_v32 = vmul.f32 %v2974_v17, %v2973_v43  ;;  %v2454_v19 = vmul.f32 %v2977_v40, %v2976_v44  ;;  %v2979_v26 = vld [vmem:[#allocation36_spill] sm:$0xff]  ;;  %v2980_v52 = vld [vmem:[#allocation70_spill] sm:$0xff] }
 0x2a9   : > { %2972 = vst [vmem:[#allocation19_spill] sm:$0xff] %v2446_v25  ;;  %v2458_v35 = vmul.f32 %v2980_v52, %v2979_v26  ;;  %v2982_v12 = vld [vmem:[#allocation37_spill] sm:$0xff]  ;;  %v2983_v5 = vld [vmem:[#allocation71_spill] sm:$0xff]  ;;  %v2985_v20 = vld [vmem:[#allocation38_spill] sm:$0xff] }
 0x2aa   : > { %2975 = vst [vmem:[#allocation20_spill] sm:$0xff] %v2450_v32  ;;  %2978 = vst [vmem:[#allocation57_spill] sm:$0xff] %v2454_v19  ;;  %v2462_v63 = vmul.f32 %v2983_v5, %v2982_v12  ;;  %v2466_v21 = vmul.f32 %v2243_v50, %v2985_v20  ;;  %v2987_v51 = vld [vmem:[#allocation39_spill] sm:$0xff]  ;;  %v2988_v25 = vld [vmem:[#allocation72_spill] sm:$0xff] }
 0x2ab   : > { %2981 = vst [vmem:[#allocation21_spill] sm:$0xff] %v2458_v35  ;;  %v2470_v43 = vmul.f32 %v2988_v25, %v2987_v51  ;;  %v2990_v17 = vld [vmem:[#allocation40_spill] sm:$0xff]  ;;  %v2991_v32 = vld [vmem:[#allocation73_spill] sm:$0xff]  ;;  %v2994_v19 = vld [vmem:[#allocation74_spill] sm:$0xff] }
 0x2ac   : > { %2984 = vst [vmem:[#allocation58_spill] sm:$0xff] %v2462_v63  ;;  %2986 = vst [vmem:[#allocation22_spill] sm:$0xff] %v2466_v21  ;;  %v2474_v44 = vmul.f32 %v2991_v32, %v2990_v17  ;;  %v2993_v40 = vld [vmem:[#allocation41_spill] sm:$0xff]  ;;  %v602_v50 = vld [vmem:[%s2482_s5] sm:$0xff] }
 0x2ad   : > { %2989 = vst [vmem:[#allocation23_spill] sm:$0xff] %v2470_v43  ;;  %v2478_v26 = vmul.f32 %v2994_v19, %v2993_v40  ;;  %v603_v5 = vld [vmem:[%s2482_s5 + $0x8] sm:$0xff]  ;;  %v604_v25 = vld [vmem:[%s2482_s5 + $0x10] sm:$0xff]  ;;  %v605_v32 = vld [vmem:[%s2482_s5 + $0x18] sm:$0xff] }
 0x2ae   : > { %2992 = vst [vmem:[#allocation59_spill] sm:$0xff] %v2474_v44  ;;  %v2996_v19 = vld [vmem:[#allocation42_spill] sm:$0xff]  ;;  %v2998_v12 = vld [vmem:[#allocation43_spill] sm:$0xff]  ;;  %v3000_v51 = vld [vmem:[#allocation44_spill] sm:$0xff] }
 0x2af   : > { %2995 = vst [vmem:[#allocation24_spill] sm:$0xff] %v2478_v26  ;;  %v2490_v52 = vmul.f32 %v2258_v42, %v2996_v19  ;;  %v2494_v20 = vmul.f32 %v2261_v7, %v2998_v12  ;;  %v2498_v17 = vmul.f32 %v2264_v57, %v3000_v51  ;;  %v3002_v40 = vld [vmem:[#allocation45_spill] sm:$0xff]  ;;  %v3003_v26 = vld [vmem:[#allocation75_spill] sm:$0xff]  ;;  %v606_v43 = vld [vmem:[%s2482_s5 + $0x20] sm:$0xff] }
 0x2b0   : > { %v2502_v44 = vmul.f32 %v3003_v26, %v3002_v40  ;;  %v607_v21 = vld [vmem:[%s2482_s5 + $0x28] sm:$0xff]  ;;  %v608_v63 = vld [vmem:[%s2482_s5 + $0x30] sm:$0xff]  ;;  %v609_v42 = vld [vmem:[%s2482_s5 + $0x38] sm:$0xff] }
 0x2b1   : > { %2997 = vst [vmem:[#allocation60_spill] sm:$0xff] %v2490_v52  ;;  %2999 = vst [vmem:[#allocation25_spill] sm:$0xff] %v2494_v20  ;;  %v3005_v19 = vld [vmem:[#allocation46_spill] sm:$0xff]  ;;  %v3007_v12 = vld [vmem:[#allocation47_spill] sm:$0xff] }
 0x2b2   : > { %3001 = vst [vmem:[#allocation61_spill] sm:$0xff] %v2498_v17  ;;  %3004 = vst [vmem:[#allocation26_spill] sm:$0xff] %v2502_v44  ;;  %v2510_v7 = vmul.f32 %v2273_v59, %v3005_v19  ;;  %v2514_v57 = vmul.f32 %v2276_v30, %v3007_v12  ;;  %v3009_v51 = vld [vmem:[#allocation48_spill] sm:$0xff]  ;;  %v3011_v40 = vld [vmem:[#allocation49_spill] sm:$0xff] }
 0x2b3   : > { %v2518_v26 = vmul.f32 %v2279_v18, %v3009_v51  ;;  %v2522_v44 = vmul.f32 %v2282_v16, %v3011_v40  ;;  %v610_v17 = vld [vmem:[%s2482_s5 + $0x40] sm:$0xff]  ;;  %v611_v20 = vld [vmem:[%s2482_s5 + $0x48] sm:$0xff]  ;;  %v612_v52 = vld [vmem:[%s2482_s5 + $0x50] sm:$0xff] }
 0x2b4   : > { %3006 = vst [vmem:[#allocation27_spill] sm:$0xff] %v2510_v7  ;;  %3008 = vst [vmem:[#allocation62_spill] sm:$0xff] %v2514_v57  ;;  %v613_v59 = vld [vmem:[%s2482_s5 + $0x58] sm:$0xff]  ;;  %v3013_v19 = vld [vmem:[#allocation50_spill] sm:$0xff] }
 0x2b5   : > { %3010 = vst [vmem:[#allocation28_spill] sm:$0xff] %v2518_v26  ;;  %3012 = vst [vmem:[#allocation63_spill] sm:$0xff] %v2522_v44  ;;  %v2530_v30 = vmul.f32 %v2285_v27, %v3013_v19  ;;  %v3015_v12 = vld [vmem:[#allocation51_spill] sm:$0xff]  ;;  %v3017_v51 = vld [vmem:[#allocation52_spill] sm:$0xff] }
 0x2b6   : > { %v2534_v18 = vmul.f32 %v2288_v31, %v3015_v12  ;;  %v2538_v16 = vmul.f32 %v2291_v24, %v3017_v51  ;;  %v3019_v40 = vld [vmem:[#allocation12_spill] sm:$0xff]  ;;  %v615_v57 = vld [vmem:[%s2482_s5 + $0x68] sm:$0xff]  ;;  %v616_v7 = vld [vmem:[%s2482_s5 + $0x70] sm:$0xff] }
 0x2b7   : > { %3014 = vst [vmem:[#allocation29_spill] sm:$0xff] %v2530_v30  ;;  %v2542_v44 = vmul.f32 %v2294_v9, %v3019_v40  ;;  %v614_v26 = vld [vmem:[%s2482_s5 + $0x60] sm:$0xff]  ;;  %v617_v27 = vld [vmem:[%s2482_s5 + $0x78] sm:$0xff]  ;;  %v3021_v19 = vld [vmem:[#allocation13_spill] sm:$0xff] }
 0x2b8   : > { %3016 = vst [vmem:[#allocation64_spill] sm:$0xff] %v2534_v18  ;;  %3018 = vst [vmem:[#allocation30_spill] sm:$0xff] %v2538_v16  ;;  %v2550_v31 = vmul.f32 %v2297_v60, %v3021_v19  ;;  %v3023_v12 = vld [vmem:[#allocation14_spill] sm:$0xff]  ;;  %v3024_v18 = vld [vmem:[#allocation76_spill] sm:$0xff] }
 0x2b9   : > { %3020 = vst [vmem:[#allocation31_spill] sm:$0xff] %v2542_v44  ;;  %v2554_v24 = vmul.f32 %v3024_v18, %v3023_v12  ;;  %v3026_v51 = vld [vmem:[#allocation15_spill] sm:$0xff]  ;;  %v3028_v40 = vld [vmem:[#allocation53_spill] sm:$0xff]  ;;  %v618_v30 = vld [vmem:[%s2482_s5 + $0x80] sm:$0xff] }
 0x2ba   : > { %3022 = vst [vmem:[#allocation65_spill] sm:$0xff] %v2550_v31  ;;  %v2558_v9 = vmul.f32 %v2303_v15, %v3026_v51  ;;  %v3029_v44 = vld [vmem:[#allocation77_spill] sm:$0xff]  ;;  %v620_v47 = vld [vmem:[%s2482_s5 + $0x90] sm:$0xff]  ;;  %v621_v60 = vld [vmem:[%s2482_s5 + $0x98] sm:$0xff] }
 0x2bb   : > { %3025 = vst [vmem:[#allocation32_spill] sm:$0xff] %v2554_v24  ;;  %v2562_v16 = vmul.f32 %v3029_v44, %v3028_v40  ;;  %v619_v35 = vld [vmem:[%s2482_s5 + $0x88] sm:$0xff]  ;;  %v3031_v19 = vld [vmem:[#allocation54_spill] sm:$0xff]  ;;  %v3033_v12 = vld [vmem:[#allocation55_spill] sm:$0xff] }
 0x2bc   : > { %3027 = vst [vmem:[#allocation66_spill] sm:$0xff] %v2558_v9  ;;  %v2570_v18 = vmul.f32 %v2309_v62, %v3031_v19  ;;  %v2574_v15 = vmul.f32 %v2312_v3, %v3033_v12  ;;  %v3035_v51 = vld [vmem:[#allocation56_spill] sm:$0xff]  ;;  %v623_v24 = vld [vmem:[%s2482_s5 + $0xa8] sm:$0xff]  ;;  %v624_v31 = vld [vmem:[%s2482_s5 + $0xb0] sm:$0xff]  ;;  %v782_v19 = vadd.f32 %v2322_v11, %v602_v50  ;;  %v783_v3 = vadd.f32 %v2326_v28, %v603_v5 }
 0x2bd   : > { %3030 = vst [vmem:[#allocation33_spill] sm:$0xff] %v2562_v16  ;;  %v2578_v44 = vmul.f32 %v2315_v36, %v3035_v51  ;;  %v3037_v40 = vld [vmem:[#allocation16_spill] sm:$0xff]  ;;  %v625_v62 = vld [vmem:[%s2482_s5 + $0xb8] sm:$0xff]  ;;  %v784_v12 = vadd.f32 %v2330_v38, %v604_v25  ;;  %v785_v36 = vadd.f32 %v2334_v22, %v605_v32  ;;  %v789_v11 = vadd.f32 %v2350_v54, %v609_v42  ;;  %v631_v38 = vld [vmem:[%s2482_s5 + $0xe8] sm:$0xff] }
 0x2be   : > { %3032 = vst [vmem:[#allocation67_spill] sm:$0xff] %v2570_v18  ;;  %3034 = vst [vmem:[#allocation34_spill] sm:$0xff] %v2574_v15  ;;  %v2582_v16 = vmul.f32 %v2318_v46, %v3037_v40  ;;  %v622_v9 = vld [vmem:[%s2482_s5 + $0xa0] sm:$0xff]  ;;  %v627_v46 = vld [vmem:[%s2482_s5 + $0xc8] sm:$0xff]  ;;  %v787_v15 = vadd.f32 %v2342_v58, %v607_v21  ;;  %v788_v18 = vadd.f32 %v2346_v56, %v608_v63 }
 0x2bf   : > { %3036 = vst [vmem:[#allocation68_spill] sm:$0xff] %v2578_v44  ;;  %v626_v51 = vld [vmem:[%s2482_s5 + $0xc0] sm:$0xff]  ;;  %v628_v40 = vld [vmem:[%s2482_s5 + $0xd0] sm:$0xff]  ;;  %v786_v44 = vadd.f32 %v2338_v39, %v606_v43  ;;  %v633_v50 = vld [vmem:[%s2482_s5 + $0xf8] sm:$0xff]  ;;  %v790_v5 = vadd.f32 %v2354_v45, %v610_v17  ;;  %v791_v25 = vadd.f32 %v2358_v0, %v611_v20  ;;  %v792_v39 = vadd.f32 %v2362_v2, %v612_v52 }
 0x2c0   : > { %3038 = vst [vmem:[#allocation35_spill] sm:$0xff] %v2582_v16  ;;  %v629_v16 = vld [vmem:[%s2482_s5 + $0xd8] sm:$0xff]  ;;  %v630_v28 = vld [vmem:[%s2482_s5 + $0xe0] sm:$0xff]  ;;  %v632_v22 = vld [vmem:[%s2482_s5 + $0xf0] sm:$0xff]  ;;  %v793_v58 = vadd.f32 %v2366_v4, %v613_v59  ;;  %v794_v2 = vadd.f32 %v2370_v29, %v614_v26  ;;  %v795_v4 = vadd.f32 %v2374_v41, %v615_v57  ;;  %v796_v63 = vadd.f32 %v2378_v53, %v616_v7 }
 0x2c1   : > { %842 = vst [vmem:[%s2610_s10] sm:$0xff] %v782_v19  ;;  %843 = vst [vmem:[%s2610_s10 + $0x8] sm:$0xff] %v783_v3  ;;  %v634_v56 = vld [vmem:[%s2482_s5 + $0x100] sm:$0xff]  ;;  %v635_v54 = vld [vmem:[%s2482_s5 + $0x108] sm:$0xff]  ;;  %v797_v21 = vadd.f32 %v2382_v13, %v617_v27  ;;  %v798_v29 = vadd.f32 %v2386_v6, %v618_v30  ;;  %v799_v41 = vadd.f32 %v2390_v37, %v619_v35 }
 0x2c2   : > { %844 = vst [vmem:[%s2610_s10 + $0x10] sm:$0xff] %v784_v12  ;;  %845 = vst [vmem:[%s2610_s10 + $0x18] sm:$0xff] %v785_v36  ;;  %v636_v45 = vld [vmem:[%s2482_s5 + $0x110] sm:$0xff]  ;;  %v637_v0 = vld [vmem:[%s2482_s5 + $0x118] sm:$0xff]  ;;  %v800_v53 = vadd.f32 %v2394_v1, %v620_v47  ;;  %v801_v13 = vadd.f32 %v2398_v61, %v621_v60  ;;  %v802_v6 = vadd.f32 %v2402_v33, %v622_v9 }
 0x2c3   : > { %846 = vst [vmem:[%s2610_s10 + $0x20] sm:$0xff] %v786_v44  ;;  %847 = vst [vmem:[%s2610_s10 + $0x28] sm:$0xff] %v787_v15  ;;  %v638_v43 = vld [vmem:[%s2482_s5 + $0x120] sm:$0xff]  ;;  %v639_v32 = vld [vmem:[%s2482_s5 + $0x128] sm:$0xff]  ;;  %v803_v37 = vadd.f32 %v2406_v8, %v623_v24  ;;  %v804_v1 = vadd.f32 %v2410_v10, %v624_v31  ;;  %v805_v61 = vadd.f32 %v2414_v55, %v625_v62 }
 0x2c4   : > { %848 = vst [vmem:[%s2610_s10 + $0x30] sm:$0xff] %v788_v18  ;;  %849 = vst [vmem:[%s2610_s10 + $0x38] sm:$0xff] %v789_v11  ;;  %v640_v52 = vld [vmem:[%s2482_s5 + $0x130] sm:$0xff]  ;;  %v641_v20 = vld [vmem:[%s2482_s5 + $0x138] sm:$0xff]  ;;  %v806_v33 = vadd.f32 %v2418_v49, %v626_v51  ;;  %v807_v8 = vadd.f32 %v2422_v14, %v627_v46  ;;  %v808_v10 = vadd.f32 %v2426_v48, %v628_v40 }
 0x2c5   : > { %850 = vst [vmem:[%s2610_s10 + $0x40] sm:$0xff] %v790_v5  ;;  %851 = vst [vmem:[%s2610_s10 + $0x48] sm:$0xff] %v791_v25  ;;  %v642_v17 = vld [vmem:[%s2482_s5 + $0x140] sm:$0xff]  ;;  %v643_v42 = vld [vmem:[%s2482_s5 + $0x148] sm:$0xff]  ;;  %v809_v55 = vadd.f32 %v2430_v34, %v629_v16  ;;  %v810_v49 = vadd.f32 %v2434_v23, %v630_v28 }
 0x2c6   : > { %852 = vst [vmem:[%s2610_s10 + $0x50] sm:$0xff] %v792_v39  ;;  %853 = vst [vmem:[%s2610_s10 + $0x58] sm:$0xff] %v793_v58  ;;  %v644_v47 = vld [vmem:[%s2482_s5 + $0x150] sm:$0xff]  ;;  %v645_v35 = vld [vmem:[%s2482_s5 + $0x158] sm:$0xff] }
 0x2c7   : > { %854 = vst [vmem:[%s2610_s10 + $0x60] sm:$0xff] %v794_v2  ;;  %855 = vst [vmem:[%s2610_s10 + $0x68] sm:$0xff] %v795_v4  ;;  %v646_v7 = vld [vmem:[%s2482_s5 + $0x160] sm:$0xff]  ;;  %v647_v57 = vld [vmem:[%s2482_s5 + $0x168] sm:$0xff] }
 0x2c8   : > { %856 = vst [vmem:[%s2610_s10 + $0x70] sm:$0xff] %v796_v63  ;;  %857 = vst [vmem:[%s2610_s10 + $0x78] sm:$0xff] %v797_v21  ;;  %v648_v26 = vld [vmem:[%s2482_s5 + $0x170] sm:$0xff]  ;;  %v649_v59 = vld [vmem:[%s2482_s5 + $0x178] sm:$0xff] }
 0x2c9   : > { %858 = vst [vmem:[%s2610_s10 + $0x80] sm:$0xff] %v798_v29  ;;  %859 = vst [vmem:[%s2610_s10 + $0x88] sm:$0xff] %v799_v41  ;;  %v3039_v14 = vld [vmem:[#allocation17_spill] sm:$0xff]  ;;  %v3040_v48 = vld [vmem:[#allocation18_spill] sm:$0xff] }
 0x2ca   : > { %860 = vst [vmem:[%s2610_s10 + $0x90] sm:$0xff] %v800_v53  ;;  %861 = vst [vmem:[%s2610_s10 + $0x98] sm:$0xff] %v801_v13  ;;  %v811_v30 = vadd.f32 %v3039_v14, %v631_v38  ;;  %v812_v27 = vadd.f32 %v3040_v48, %v632_v22  ;;  %v3041_v34 = vld [vmem:[#allocation19_spill] sm:$0xff]  ;;  %v650_v31 = vld [vmem:[%s2482_s5 + $0x180] sm:$0xff] }
 0x2cb   : > { %v813_v16 = vadd.f32 %v3041_v34, %v633_v50  ;;  %862 = vst [vmem:[%s2610_s10 + $0xa0] sm:$0xff] %v802_v6  ;;  %863 = vst [vmem:[%s2610_s10 + $0xa8] sm:$0xff] %v803_v37  ;;  %v651_v24 = vld [vmem:[%s2482_s5 + $0x188] sm:$0xff]  ;;  %v652_v9 = vld [vmem:[%s2482_s5 + $0x190] sm:$0xff] }
 0x2cc   : > { %864 = vst [vmem:[%s2610_s10 + $0xb0] sm:$0xff] %v804_v1  ;;  %865 = vst [vmem:[%s2610_s10 + $0xb8] sm:$0xff] %v805_v61  ;;  %v3042_v23 = vld [vmem:[#allocation20_spill] sm:$0xff]  ;;  %v3043_v18 = vld [vmem:[#allocation57_spill] sm:$0xff] }
 0x2cd   : > { %v814_v60 = vadd.f32 %v3042_v23, %v634_v56  ;;  %v815_v15 = vadd.f32 %v3043_v18, %v635_v54  ;;  %v3044_v44 = vld [vmem:[#allocation21_spill] sm:$0xff]  ;;  %v3045_v19 = vld [vmem:[#allocation58_spill] sm:$0xff]  ;;  %866 = vst [vmem:[%s2610_s10 + $0xc0] sm:$0xff] %v806_v33  ;;  %867 = vst [vmem:[%s2610_s10 + $0xc8] sm:$0xff] %v807_v8 }
 0x2ce   : > { %v816_v62 = vadd.f32 %v3044_v44, %v636_v45  ;;  %v817_v3 = vadd.f32 %v3045_v19, %v637_v0  ;;  %868 = vst [vmem:[%s2610_s10 + $0xd0] sm:$0xff] %v808_v10  ;;  %869 = vst [vmem:[%s2610_s10 + $0xd8] sm:$0xff] %v809_v55  ;;  %v653_v12 = vld [vmem:[%s2482_s5 + $0x198] sm:$0xff]  ;;  %v654_v36 = vld [vmem:[%s2482_s5 + $0x1a0] sm:$0xff] }
 0x2cf   : > { %v655_v51 = vld [vmem:[%s2482_s5 + $0x1a8] sm:$0xff]  ;;  %v3046_v46 = vld [vmem:[#allocation22_spill] sm:$0xff]  ;;  %v3047_v11 = vld [vmem:[#allocation23_spill] sm:$0xff]  ;;  %870 = vst [vmem:[%s2610_s10 + $0xe0] sm:$0xff] %v810_v49 }
 0x2d0   : > { %v818_v40 = vadd.f32 %v3046_v46, %v638_v43  ;;  %v819_v28 = vadd.f32 %v3047_v11, %v639_v32  ;;  %v3048_v38 = vld [vmem:[#allocation59_spill] sm:$0xff]  ;;  %v3049_v50 = vld [vmem:[#allocation24_spill] sm:$0xff]  ;;  %871 = vst [vmem:[%s2610_s10 + $0xe8] sm:$0xff] %v811_v30  ;;  %872 = vst [vmem:[%s2610_s10 + $0xf0] sm:$0xff] %v812_v27 }
 0x2d1   : > { %v820_v22 = vadd.f32 %v3048_v38, %v640_v52  ;;  %v821_v5 = vadd.f32 %v3049_v50, %v641_v20  ;;  %873 = vst [vmem:[%s2610_s10 + $0xf8] sm:$0xff] %v813_v16  ;;  %v656_v25 = vld [vmem:[%s2482_s5 + $0x1b0] sm:$0xff]  ;;  %v657_v39 = vld [vmem:[%s2482_s5 + $0x1b8] sm:$0xff]  ;;  %v658_v58 = vld [vmem:[%s2482_s5 + $0x1c0] sm:$0xff] }
 0x2d2   : > { %v3050_v56 = vld [vmem:[#allocation60_spill] sm:$0xff]  ;;  %v3051_v45 = vld [vmem:[#allocation25_spill] sm:$0xff]  ;;  %v3053_v63 = vld [vmem:[#allocation26_spill] sm:$0xff]  ;;  %874 = vst [vmem:[%s2610_s10 + $0x100] sm:$0xff] %v814_v60 }
 0x2d3   : > { %v822_v54 = vadd.f32 %v3050_v56, %v642_v17  ;;  %v823_v0 = vadd.f32 %v3051_v45, %v643_v42  ;;  %v3052_v2 = vld [vmem:[#allocation61_spill] sm:$0xff]  ;;  %v825_v21 = vadd.f32 %v3053_v63, %v645_v35  ;;  %875 = vst [vmem:[%s2610_s10 + $0x108] sm:$0xff] %v815_v15  ;;  %876 = vst [vmem:[%s2610_s10 + $0x110] sm:$0xff] %v816_v62  ;;  %v660_v32 = vld [vmem:[%s2482_s5 + $0x1d0] sm:$0xff] }
 0x2d4   : > { %v824_v4 = vadd.f32 %v3052_v2, %v644_v47  ;;  %877 = vst [vmem:[%s2610_s10 + $0x118] sm:$0xff] %v817_v3  ;;  %v659_v43 = vld [vmem:[%s2482_s5 + $0x1c8] sm:$0xff]  ;;  %v661_v52 = vld [vmem:[%s2482_s5 + $0x1d8] sm:$0xff]  ;;  %v3055_v53 = vld [vmem:[#allocation62_spill] sm:$0xff] }
 0x2d5   : > { %v3054_v29 = vld [vmem:[#allocation27_spill] sm:$0xff]  ;;  %v827_v13 = vadd.f32 %v3055_v53, %v647_v57  ;;  %v3056_v20 = vld [vmem:[#allocation28_spill] sm:$0xff]  ;;  %878 = vst [vmem:[%s2610_s10 + $0x120] sm:$0xff] %v818_v40  ;;  %879 = vst [vmem:[%s2610_s10 + $0x128] sm:$0xff] %v819_v28 }
 0x2d6   : > { %v826_v41 = vadd.f32 %v3054_v29, %v646_v7  ;;  %v828_v17 = vadd.f32 %v3056_v20, %v648_v26  ;;  %v3057_v42 = vld [vmem:[#allocation63_spill] sm:$0xff]  ;;  %880 = vst [vmem:[%s2610_s10 + $0x130] sm:$0xff] %v820_v22  ;;  %881 = vst [vmem:[%s2610_s10 + $0x138] sm:$0xff] %v821_v5  ;;  %v3058_v37 = vld [vmem:[#allocation29_spill] sm:$0xff] }
 0x2d7   : > { %v829_v6 = vadd.f32 %v3057_v42, %v649_v59  ;;  %v830_v1 = vadd.f32 %v3058_v37, %v650_v31  ;;  %v3059_v61 = vld [vmem:[#allocation64_spill] sm:$0xff]  ;;  %v3060_v35 = vld [vmem:[#allocation30_spill] sm:$0xff]  ;;  %v3061_v33 = vld [vmem:[#allocation31_spill] sm:$0xff]  ;;  %882 = vst [vmem:[%s2610_s10 + $0x140] sm:$0xff] %v822_v54 }
 0x2d8   : > { %v831_v47 = vadd.f32 %v3059_v61, %v651_v24  ;;  %v832_v7 = vadd.f32 %v3060_v35, %v652_v9  ;;  %v833_v8 = vadd.f32 %v3061_v33, %v653_v12  ;;  %883 = vst [vmem:[%s2610_s10 + $0x148] sm:$0xff] %v823_v0  ;;  %884 = vst [vmem:[%s2610_s10 + $0x150] sm:$0xff] %v824_v4  ;;  %v3062_v10 = vld [vmem:[#allocation65_spill] sm:$0xff]  ;;  %v3063_v57 = vld [vmem:[#allocation32_spill] sm:$0xff] }
 0x2d9   : > { %885 = vst [vmem:[%s2610_s10 + $0x158] sm:$0xff] %v825_v21  ;;  %v834_v55 = vadd.f32 %v3062_v10, %v654_v36  ;;  %v835_v26 = vadd.f32 %v3063_v57, %v655_v51  ;;  %v3064_v59 = vld [vmem:[#allocation66_spill] sm:$0xff]  ;;  %v3065_v14 = vld [vmem:[#allocation33_spill] sm:$0xff]  ;;  %886 = vst [vmem:[%s2610_s10 + $0x160] sm:$0xff] %v826_v41 }
 0x2da   : > { %v836_v49 = vadd.f32 %v3064_v59, %v656_v25  ;;  %v837_v30 = vadd.f32 %v3065_v14, %v657_v39  ;;  %887 = vst [vmem:[%s2610_s10 + $0x168] sm:$0xff] %v827_v13  ;;  %888 = vst [vmem:[%s2610_s10 + $0x170] sm:$0xff] %v828_v17  ;;  %v3066_v48 = vld [vmem:[#allocation67_spill] sm:$0xff]  ;;  %v3067_v34 = vld [vmem:[#allocation34_spill] sm:$0xff] }
 0x2db   : > { %889 = vst [vmem:[%s2610_s10 + $0x178] sm:$0xff] %v829_v6  ;;  %v838_v27 = vadd.f32 %v3066_v48, %v658_v58  ;;  %v839_v16 = vadd.f32 %v3067_v34, %v659_v43  ;;  %v3068_v31 = vld [vmem:[#allocation68_spill] sm:$0xff]  ;;  %v3069_v9 = vld [vmem:[#allocation35_spill] sm:$0xff]  ;;  %890 = vst [vmem:[%s2610_s10 + $0x180] sm:$0xff] %v830_v1 }
 0x2dc   : > { %v840_v24 = vadd.f32 %v3068_v31, %v660_v32  ;;  %v841_v23 = vadd.f32 %v3069_v9, %v661_v52  ;;  %891 = vst [vmem:[%s2610_s10 + $0x188] sm:$0xff] %v831_v47  ;;  %892 = vst [vmem:[%s2610_s10 + $0x190] sm:$0xff] %v832_v7 }
 0x2dd   : > { %893 = vst [vmem:[%s2610_s10 + $0x198] sm:$0xff] %v833_v8  ;;  %894 = vst [vmem:[%s2610_s10 + $0x1a0] sm:$0xff] %v834_v55 }
 0x2de   : > { %895 = vst [vmem:[%s2610_s10 + $0x1a8] sm:$0xff] %v835_v26  ;;  %896 = vst [vmem:[%s2610_s10 + $0x1b0] sm:$0xff] %v836_v49 }
 0x2df   : > { %897 = vst [vmem:[%s2610_s10 + $0x1b8] sm:$0xff] %v837_v30  ;;  %898 = vst [vmem:[%s2610_s10 + $0x1c0] sm:$0xff] %v838_v27 }
 0x2e0   : > { %899 = vst [vmem:[%s2610_s10 + $0x1c8] sm:$0xff] %v839_v16  ;;  %900 = vst [vmem:[%s2610_s10 + $0x1d0] sm:$0xff] %v840_v24 }
 0x2e1   : > { %901 = vst [vmem:[%s2610_s10 + $0x1d8] sm:$0xff] %v841_v23 }
 0x2e2   : > { %1204 = shalt.err (!%p1201_p12)
}
 0x2e3   : > { %s1205_s17 = scalar_lea.hbm %s2747_s28, 7680  ;;  %s1209_s27 = scalar_lea.hbm %s2801_s3, 61440 }
 0x2e4   : > { %p1206_p5 = scmp.ne.s32.totalorder %s2747_s28, %s1205_s17  ;;  %p1210_p11 = scmp.lt.u32.totalorder %s2747_s28, %s2801_s3 }
 0x2e5   : > { %p1211_p1 = scmp.lt.u32.totalorder %s1209_s27, %s1205_s17  ;;  %p1213_p6 = scmp.lt.u32.totalorder %s1205_s17, %s2747_s28 }
 0x2e6   : > { %p1207_p0 = pnand %p1206_p5, %p1401_p4 }
 0x2e7   : > { %p1212_p2 = por %p1211_p1, %p1210_p11 }
 0x2e8   : > { %p1208_p10 = pneg %p1207_p0 }
 0x2e9   : > { %p1214_p8 = por %p1213_p6, %p1212_p2 }
 0x2eb   : > { %p1215_p13 = pnand %p1214_p8, %p1208_p10 }
 0x2ed   : > { %1218 = shalt.err (!%p1215_p13)
}
 0x2ee   : > { %1044 = dma.vmem_to_hbm [thread:$0]  (%p1401_p4), %s2749_s25, 7680, %s2747_s28, %s903_s22  }
 0x2ef PF: > { %p1066_p3 = scmp.ge.s32.totalorder %s1261_s15, 2  ;;  %s929_s23 = sand.u32 1, %s1249_s12  }
 0x2f0   : > { %p3070_p7 = scmp.ne.s32.totalorder %s2856_s19, 0  ;;  %s930_s5 = scalar_lea.sflag [#allocation4], %s929_s23 }
 0x2f2   : > { %p1058_p9 = pnand %p1066_p3, %p3070_p7 }
 0x2f4   : > { %1244 = dma.done.wait (!%p1058_p9), %s930_s5, 7680  }
 0x2f5   : > { %1246 = vsyncadd (!%p1058_p9), %s930_s5, 4294959616  ;;  %p17_p12 = scmp.ge.s32.totalorder %s1391_s4, 10   ;;  %s3071_s12 = smov %s1253_s13 }
 0x2f6   : > { %s3072_s13 = smov %s1257_s14  ;;  %s3073_s14 = smov %s1407_s9 }
 0x2f7   : > { %s3074_s15 = smov %s1391_s4  ;;  %19 = sbr.rel (!%p17_p12) target bundleno = 6 (0x6), region = 87 }
 0x2fe   :  { %935 = vsyncpa [#allocation3], 1 }
 0x2ff   :  { %937 = vsyncpa [#allocation3 + $0x1], 1 }
 0x300   :  { %938 = vsyncpa [#allocation6], 1 }
 0x301   :  { %939 = vsyncpa [#allocation4], 1 }
 0x302   :  { %941 = vsyncpa [#allocation4 + $0x1], 1 }

</bundles_post_ra>
